<compile_context>
chip_gen: v5e
topology: v5e:2x2
jax: 0.10.0
libtpu: 0.0.40
codegen_flags: <defaults>
</compile_context>

<pallas_src>
import math
import jax
import jax.numpy as jnp
from jax.experimental import pallas as pl

# ----------------------------- model sizes (small) --------------------------
B = 2            # batch
H = W = 16       # spatial
HW = H * W
CIN = 4          # backbone.num_channels[0]
D = 32           # transformer.d_model (hidden_dim); GroupNorm(32, D)
G = 32           # groups in GroupNorm (D == G -> group size 1)
Q = 8            # num_queries
NUM_CLASSES = 8
L = 2            # number of decoder layers (hs.shape[0])
GN_EPS = 1e-5
OUT_W = 128      # lane-dense packed head output width (>= NUM_CLASSES + 4)
M = L * B * Q    # rows fed to the detection head


# ---------------------- Pallas kernel 1: fused input_proj -------------------
# feat = tanh(x3 @ Wb + bb)            (stub backbone pointwise conv, fused)
# y    = feat @ Wp + bp                (input_proj 1x1 conv)
# out  = GroupNorm(G, D)(y) * gamma + beta
def make_input_proj(batch, hw, cin, d, groups, eps):
    assert d % groups == 0
    assert d // groups == 1, (
        "kernel implements GroupNorm with group size 1 (D == groups); "
        "the general grouped reduction is not needed for this config")
    inv_cnt = 1.0 / float(hw * (d // groups))

    def kernel(x_ref, wb_ref, bb_ref, wp_ref, gn_ref, o_ref):
        wb = wb_ref[...]                 # (3, CIN)  stub backbone pointwise
        bb = bb_ref[...]                 # (1, CIN)
        wp = wp_ref[...]                 # (CIN, D)  input_proj 1x1 conv
        bp = gn_ref[0]                   # (1, D)    conv bias
        gamma = gn_ref[1]                # (1, D)    GroupNorm affine scale
        beta = gn_ref[2]                 # (1, D)    GroupNorm affine shift
        # Static per-sample loop: the whole batch is handled in one launch.
        for i in range(batch):
            x = x_ref[i]                                         # (HW, 3)
            feat = jnp.tanh(
                jnp.dot(x, wb, preferred_element_type=jnp.float32) + bb)
            y = jnp.dot(feat, wp, preferred_element_type=jnp.float32) + bp
            # GroupNorm (group size 1 -> per-channel over spatial), two-pass
            # mean/var to avoid E[x^2] - E[x]^2 cancellation.
            mean = jnp.sum(y, axis=0, keepdims=True) * inv_cnt   # (1, D)
            diff = y - mean
            var = jnp.sum(diff * diff, axis=0, keepdims=True) * inv_cnt
            o_ref[i] = diff * jax.lax.rsqrt(var + eps) * gamma + beta

    def fn(x3, wb, bb, wp, gn_pack):
        return pl.pallas_call(
            kernel,
            out_shape=jax.ShapeDtypeStruct((batch, hw, d), jnp.float32),
        )(x3, wb, bb, wp, gn_pack)

    return fn


# -------------- Pallas kernel 2: bbox MLP + ref add + class head ------------
# Consolidated inputs:
#   hs    (M, D)           decoder outputs, all layers flattened
#   refb  (M, OUT_W)       class bias (lanes [0,NC)) + bbox bias + inverse-
#                          sigmoid reference (lanes [NC,NC+2)) pre-packed
#   w12   (2, D, D)        bbox_embed layers 1 & 2
#   b12   (2, 1, D)        their biases
#   wpack (2, D, OUT_W)    [class_embed W padded to lanes [0,NC);
#                           bbox layer-3 W padded to lanes [NC,NC+4)]
# Output: one lane-dense (M, OUT_W) slab.
def make_head(m, d, num_classes, out_w):
    assert num_classes + 4 <= out_w

    def kernel(hs_ref, refb_ref, w12_ref, b12_ref, wpack_ref, out_ref):
        x = hs_ref[...]                                          # (M, D)
        h = jnp.maximum(
            jnp.dot(x, w12_ref[0], preferred_element_type=jnp.float32)
            + b12_ref[0], 0.0)
        h = jnp.maximum(
            jnp.dot(h, w12_ref[1], preferred_element_type=jnp.float32)
            + b12_ref[1], 0.0)
        # Lane-packed final layer: class head from x, bbox layer-3 from h;
        # biases + reference are pre-packed into refb_ref.
        pre = (jnp.dot(x, wpack_ref[0], preferred_element_type=jnp.float32)
               + jnp.dot(h, wpack_ref[1], preferred_element_type=jnp.float32)
               + refb_ref[...])                                  # (M, OUT_W)
        lane = jax.lax.broadcasted_iota(jnp.int32, pre.shape, 1)
        is_box = (lane >= num_classes) & (lane < num_classes + 4)
        # sigmoid = exp (EUP) + approx reciprocal (EUP); clip only guards the
        # approx-reciprocal rounding so boxes stay inside [0, 1].
        sig = jnp.clip(pl.reciprocal(1.0 + jnp.exp(-pre), approx=True),
                       0.0, 1.0)
        out_ref[...] = jnp.where(is_box, sig, pre)

    def fn(hs_flat, refb_pack, w12, b12, wpack):
        return pl.pallas_call(
            kernel,
            out_shape=jax.ShapeDtypeStruct((m, out_w), jnp.float32),
        )(hs_flat, refb_pack, w12, b12, wpack)

    return fn


input_proj_pallas = make_input_proj(B, HW, CIN, D, G, GN_EPS)
head_pallas = make_head(M, D, NUM_CLASSES, OUT_W)


# ------------------------------- glue / stubs -------------------------------
def inverse_sigmoid(x, eps=1e-5):
    x = jnp.clip(x, 0.0, 1.0)
    x1 = jnp.clip(x, eps, None)
    x2 = jnp.clip(1.0 - x, eps, None)
    return jnp.log(x1 / x2)


def init_params(key):
    ks = jax.random.split(key, 12)
    scale = 0.02
    prior_prob = 0.01
    bias_value = -math.log((1.0 - prior_prob) / prior_prob)
    params = dict(
        # stub backbone (3 -> CIN pointwise) and positional encoding
        backbone_w=scale * jax.random.normal(ks[0], (3, CIN), jnp.float32),
        backbone_b=jnp.zeros((1, CIN), jnp.float32),
        pos=scale * jax.random.normal(ks[1], (1, HW, D), jnp.float32),
        # input_proj: Conv2d(CIN, D, 1) + GroupNorm(32, D)
        proj_w=scale * jax.random.normal(ks[2], (CIN, D), jnp.float32),
        proj_b=jnp.zeros((1, D), jnp.float32),
        gn_gamma=jnp.ones((1, D), jnp.float32),
        gn_beta=jnp.zeros((1, D), jnp.float32),
        # query embedding + stub reference-point projection
        query_embed=scale * jax.random.normal(ks[3], (Q, D), jnp.float32),
        ref_w=scale * jax.random.normal(ks[4], (D, 2), jnp.float32),
        ref_b=jnp.zeros((2,), jnp.float32),
        # bbox_embed MLP(D, D, 4, 3); last layer zero-initialized (as in module)
        bbox_w1=scale * jax.random.normal(ks[5], (D, D), jnp.float32),
        bbox_b1=jnp.zeros((1, D), jnp.float32),
        bbox_w2=scale * jax.random.normal(ks[6], (D, D), jnp.float32),
        bbox_b2=jnp.zeros((1, D), jnp.float32),
        bbox_w3=jnp.zeros((D, 4), jnp.float32),
        bbox_b3=jnp.zeros((1, 4), jnp.float32),
        # class_embed Linear(D, num_classes) with prior-prob bias
        cls_w=scale * jax.random.normal(ks[7], (D, NUM_CLASSES), jnp.float32),
        cls_b=jnp.full((1, NUM_CLASSES), bias_value, jnp.float32),
    )
    return params


def transformer_stub(src, mask_flat, pos, params):
    # deterministic stand-in for the conditional-DETR transformer
    valid = (~mask_flat).astype(jnp.float32)[..., None]                # [B, HW, 1]
    mem = jnp.sum((src + pos) * valid, axis=1) / jnp.maximum(
        jnp.sum(valid, axis=1), 1.0)                                   # [B, D]
    qe = params["query_embed"]                                         # [Q, D]
    h = jnp.broadcast_to(qe[None], (B, Q, D))
    hs = []
    for l in range(L):
        h = jnp.tanh(h + (0.5 + 0.1 * l) * mem[:, None, :])
        hs.append(h)
    hs = jnp.stack(hs)                                                 # [L, B, Q, D]
    reference = jax.nn.sigmoid(qe @ params["ref_w"] + params["ref_b"]) # [Q, 2]
    reference = jnp.broadcast_to(reference[None], (B, Q, 2))
    return hs, reference


def pack_head_params(params):
    w12 = jnp.stack([params["bbox_w1"], params["bbox_w2"]])            # (2, D, D)
    b12 = jnp.stack([params["bbox_b1"], params["bbox_b2"]])            # (2, 1, D)
    wc_pad = jnp.pad(params["cls_w"], ((0, 0), (0, OUT_W - NUM_CLASSES)))
    w3_pad = jnp.pad(params["bbox_w3"],
                     ((0, 0), (NUM_CLASSES, OUT_W - NUM_CLASSES - 4)))
    wpack = jnp.stack([wc_pad, w3_pad])                                # (2, D, OUT_W)
    bias_row = jnp.concatenate(
        [params["cls_b"], params["bbox_b3"],
         jnp.zeros((1, OUT_W - NUM_CLASSES - 4), jnp.float32)], axis=1)
    return w12, b12, wpack, bias_row                                   # bias_row (1, OUT_W)


def conditional_detr_forward(samples, mask, params):
    # NCHW images -> channels-last flattened [B, HW, 3]
    x3 = jnp.transpose(samples.reshape(B, 3, HW), (0, 2, 1))
    mask_flat = mask.reshape(B, HW)                        # True on padded pixels
    pos = jnp.broadcast_to(params["pos"], (B, HW, D))

    # fused stub-backbone pointwise + input_proj (1x1 conv + GroupNorm) — Pallas
    gn_pack = jnp.stack([params["proj_b"], params["gn_gamma"],
                         params["gn_beta"]])               # (3, 1, D)
    src = input_proj_pallas(x3, params["backbone_w"], params["backbone_b"],
                            params["proj_w"], gn_pack)     # [B, HW, D]

    hs, reference = transformer_stub(src, mask_flat, pos, params)  # [L,B,Q,D], [B,Q,2]

    # detection head — Pallas (single lane-dense packed output)
    w12, b12, wpack, bias_row = pack_head_params(params)
    ref_bs = inverse_sigmoid(reference)                                 # [B, Q, 2]
    ref_pack = jnp.pad(ref_bs, ((0, 0), (0, 0),
                                (NUM_CLASSES, OUT_W - NUM_CLASSES - 2)))  # [B,Q,OUT_W]
    refb_pack = (jnp.broadcast_to(ref_pack[None], (L, B, Q, OUT_W))
                 .reshape(M, OUT_W) + bias_row)                          # (M, OUT_W)
    hs_flat = hs.reshape(M, D)

    packed = head_pallas(hs_flat, refb_pack, w12, b12, wpack)            # (M, OUT_W)
    outputs_class = packed[:, :NUM_CLASSES].reshape(L, B, Q, NUM_CLASSES)
    outputs_coord = packed[:, NUM_CLASSES:NUM_CLASSES + 4].reshape(L, B, Q, 4)
    return {"pred_logits": outputs_class[-1], "pred_boxes": outputs_coord[-1]}


if __name__ == "__main__":
    key = jax.random.PRNGKey(0)
    k_img, k_par = jax.random.split(key)
    samples = jax.random.normal(k_img, (B, 3, H, W), jnp.float32)      # NCHW images
    mask = jnp.zeros((B, H, W), dtype=bool).at[:, :, -2:].set(True)    # padded columns
    params = init_params(k_par)

    out = conditional_detr_forward(samples, mask, params)
    jax.block_until_ready(out)

    assert out["pred_logits"].shape == (B, Q, NUM_CLASSES)
    assert out["pred_boxes"].shape == (B, Q, 4)
    assert bool(jnp.all(jnp.isfinite(out["pred_logits"])))
    assert bool(jnp.all((out["pred_boxes"] >= 0.0) & (out["pred_boxes"] <= 1.0)))
    print("KERNEL_OK")
</pallas_src>

<mosaic_0001>
module attributes {stable_mosaic.version = 11 : i64} {
  func.func @kernel(%arg0: memref<2x256x3xf32, #tpu.memory_space<vmem>>, %arg1: memref<3x4xf32, #tpu.memory_space<vmem>>, %arg2: memref<1x4xf32, #tpu.memory_space<vmem>>, %arg3: memref<4x32xf32, #tpu.memory_space<vmem>>, %arg4: memref<3x1x32xf32, #tpu.memory_space<vmem>>, %arg5: memref<2x256x32xf32, #tpu.memory_space<vmem>>) attributes {dimension_semantics = [], scalar_prefetch = 0 : i64, scratch_operands = 0 : i64, tpu.core_type = #tpu.core_type<tc>} {
    %c0 = arith.constant 0 : index
    %c0_0 = arith.constant 0 : index
    %0 = vector.load %arg1[%c0, %c0_0] : memref<3x4xf32, #tpu.memory_space<vmem>>, vector<3x4xf32>
    %c0_1 = arith.constant 0 : index
    %c0_2 = arith.constant 0 : index
    %1 = vector.load %arg2[%c0_1, %c0_2] : memref<1x4xf32, #tpu.memory_space<vmem>>, vector<1x4xf32>
    %c0_3 = arith.constant 0 : index
    %c0_4 = arith.constant 0 : index
    %2 = vector.load %arg3[%c0_3, %c0_4] : memref<4x32xf32, #tpu.memory_space<vmem>>, vector<4x32xf32>
    %c0_5 = arith.constant 0 : index
    %c0_6 = arith.constant 0 : index
    %c0_7 = arith.constant 0 : index
    %3 = vector.load %arg4[%c0_5, %c0_6, %c0_7] : memref<3x1x32xf32, #tpu.memory_space<vmem>>, vector<1x1x32xf32>
    %4 = vector.shape_cast %3 : vector<1x1x32xf32> to vector<1x32xf32>
    %c1 = arith.constant 1 : index
    %c0_8 = arith.constant 0 : index
    %c0_9 = arith.constant 0 : index
    %5 = vector.load %arg4[%c1, %c0_8, %c0_9] : memref<3x1x32xf32, #tpu.memory_space<vmem>>, vector<1x1x32xf32>
    %6 = vector.shape_cast %5 : vector<1x1x32xf32> to vector<1x32xf32>
    %c2 = arith.constant 2 : index
    %c0_10 = arith.constant 0 : index
    %c0_11 = arith.constant 0 : index
    %7 = vector.load %arg4[%c2, %c0_10, %c0_11] : memref<3x1x32xf32, #tpu.memory_space<vmem>>, vector<1x1x32xf32>
    %8 = vector.shape_cast %7 : vector<1x1x32xf32> to vector<1x32xf32>
    %c0_12 = arith.constant 0 : index
    %c0_13 = arith.constant 0 : index
    %c0_14 = arith.constant 0 : index
    %9 = vector.load %arg0[%c0_12, %c0_13, %c0_14] : memref<2x256x3xf32, #tpu.memory_space<vmem>>, vector<1x256x3xf32>
    %10 = vector.shape_cast %9 : vector<1x256x3xf32> to vector<256x3xf32>
    %cst = arith.constant dense<0.000000e+00> : vector<256x4xf32>
    %11 = tpu.matmul %10, %0, %cst {dimension_numbers = #tpu.dot_dimension_numbers<[1], [0], [0], [1], [0, 0, 1, 1], [], []>} : vector<256x3xf32>, vector<3x4xf32>, vector<256x4xf32> -> vector<256x4xf32>
    %12 = vector.broadcast %1 : vector<1x4xf32> to vector<256x4xf32>
    %13 = arith.addf %11, %12 : vector<256x4xf32>
    %14 = math.tanh %13 : vector<256x4xf32>
    %cst_15 = arith.constant dense<0.000000e+00> : vector<256x32xf32>
    %15 = tpu.matmul %14, %2, %cst_15 {dimension_numbers = #tpu.dot_dimension_numbers<[1], [0], [0], [1], [0, 0, 1, 1], [], []>} : vector<256x4xf32>, vector<4x32xf32>, vector<256x32xf32> -> vector<256x32xf32>
    %16 = vector.broadcast %4 : vector<1x32xf32> to vector<256x32xf32>
    %17 = arith.addf %15, %16 : vector<256x32xf32>
    %cst_16 = arith.constant dense<0.000000e+00> : vector<32xf32>
    %18 = vector.multi_reduction <add>, %17, %cst_16 [0] : vector<256x32xf32> to vector<32xf32>
    %19 = vector.shape_cast %18 : vector<32xf32> to vector<1x32xf32>
    %cst_17 = arith.constant 3.906250e-03 : f32
    %20 = vector.broadcast %cst_17 : f32 to vector<1x32xf32>
    %21 = arith.mulf %19, %20 : vector<1x32xf32>
    %22 = vector.broadcast %21 : vector<1x32xf32> to vector<256x32xf32>
    %23 = arith.subf %17, %22 : vector<256x32xf32>
    %24 = arith.mulf %23, %23 : vector<256x32xf32>
    %cst_18 = arith.constant dense<0.000000e+00> : vector<32xf32>
    %25 = vector.multi_reduction <add>, %24, %cst_18 [0] : vector<256x32xf32> to vector<32xf32>
    %26 = vector.shape_cast %25 : vector<32xf32> to vector<1x32xf32>
    %cst_19 = arith.constant 3.906250e-03 : f32
    %27 = vector.broadcast %cst_19 : f32 to vector<1x32xf32>
    %28 = arith.mulf %26, %27 : vector<1x32xf32>
    %cst_20 = arith.constant 9.99999974E-6 : f32
    %29 = vector.broadcast %cst_20 : f32 to vector<1x32xf32>
    %30 = arith.addf %28, %29 : vector<1x32xf32>
    %31 = math.rsqrt %30 : vector<1x32xf32>
    %32 = vector.broadcast %31 : vector<1x32xf32> to vector<256x32xf32>
    %33 = arith.mulf %23, %32 : vector<256x32xf32>
    %34 = vector.broadcast %6 : vector<1x32xf32> to vector<256x32xf32>
    %35 = arith.mulf %33, %34 : vector<256x32xf32>
    %36 = vector.broadcast %8 : vector<1x32xf32> to vector<256x32xf32>
    %37 = arith.addf %35, %36 : vector<256x32xf32>
    %c0_21 = arith.constant 0 : index
    %c0_22 = arith.constant 0 : index
    %c0_23 = arith.constant 0 : index
    %38 = vector.load %arg5[%c0_21, %c0_22, %c0_23] : memref<2x256x32xf32, #tpu.memory_space<vmem>>, vector<1x256x32xf32>
    %39 = vector.shape_cast %38 : vector<1x256x32xf32> to vector<256x32xf32>
    %40 = vector.shape_cast %37 : vector<256x32xf32> to vector<1x256x32xf32>
    tpu.vector_store %arg5[%c0_21, %c0_22, %c0_23], %40 {strides = array<i32>} : memref<2x256x32xf32, #tpu.memory_space<vmem>>, vector<1x256x32xf32>,
    %c1_24 = arith.constant 1 : index
    %c0_25 = arith.constant 0 : index
    %c0_26 = arith.constant 0 : index
    %41 = vector.load %arg0[%c1_24, %c0_25, %c0_26] : memref<2x256x3xf32, #tpu.memory_space<vmem>>, vector<1x256x3xf32>
    %42 = vector.shape_cast %41 : vector<1x256x3xf32> to vector<256x3xf32>
    %cst_27 = arith.constant dense<0.000000e+00> : vector<256x4xf32>
    %43 = tpu.matmul %42, %0, %cst_27 {dimension_numbers = #tpu.dot_dimension_numbers<[1], [0], [0], [1], [0, 0, 1, 1], [], []>} : vector<256x3xf32>, vector<3x4xf32>, vector<256x4xf32> -> vector<256x4xf32>
    %44 = vector.broadcast %1 : vector<1x4xf32> to vector<256x4xf32>
    %45 = arith.addf %43, %44 : vector<256x4xf32>
    %46 = math.tanh %45 : vector<256x4xf32>
    %cst_28 = arith.constant dense<0.000000e+00> : vector<256x32xf32>
    %47 = tpu.matmul %46, %2, %cst_28 {dimension_numbers = #tpu.dot_dimension_numbers<[1], [0], [0], [1], [0, 0, 1, 1], [], []>} : vector<256x4xf32>, vector<4x32xf32>, vector<256x32xf32> -> vector<256x32xf32>
    %48 = vector.broadcast %4 : vector<1x32xf32> to vector<256x32xf32>
    %49 = arith.addf %47, %48 : vector<256x32xf32>
    %cst_29 = arith.constant dense<0.000000e+00> : vector<32xf32>
    %50 = vector.multi_reduction <add>, %49, %cst_29 [0] : vector<256x32xf32> to vector<32xf32>
    %51 = vector.shape_cast %50 : vector<32xf32> to vector<1x32xf32>
    %cst_30 = arith.constant 3.906250e-03 : f32
    %52 = vector.broadcast %cst_30 : f32 to vector<1x32xf32>
    %53 = arith.mulf %51, %52 : vector<1x32xf32>
    %54 = vector.broadcast %53 : vector<1x32xf32> to vector<256x32xf32>
    %55 = arith.subf %49, %54 : vector<256x32xf32>
    %56 = arith.mulf %55, %55 : vector<256x32xf32>
    %cst_31 = arith.constant dense<0.000000e+00> : vector<32xf32>
    %57 = vector.multi_reduction <add>, %56, %cst_31 [0] : vector<256x32xf32> to vector<32xf32>
    %58 = vector.shape_cast %57 : vector<32xf32> to vector<1x32xf32>
    %cst_32 = arith.constant 3.906250e-03 : f32
    %59 = vector.broadcast %cst_32 : f32 to vector<1x32xf32>
    %60 = arith.mulf %58, %59 : vector<1x32xf32>
    %cst_33 = arith.constant 9.99999974E-6 : f32
    %61 = vector.broadcast %cst_33 : f32 to vector<1x32xf32>
    %62 = arith.addf %60, %61 : vector<1x32xf32>
    %63 = math.rsqrt %62 : vector<1x32xf32>
    %64 = vector.broadcast %63 : vector<1x32xf32> to vector<256x32xf32>
    %65 = arith.mulf %55, %64 : vector<256x32xf32>
    %66 = vector.broadcast %6 : vector<1x32xf32> to vector<256x32xf32>
    %67 = arith.mulf %65, %66 : vector<256x32xf32>
    %68 = vector.broadcast %8 : vector<1x32xf32> to vector<256x32xf32>
    %69 = arith.addf %67, %68 : vector<256x32xf32>
    %c1_34 = arith.constant 1 : index
    %c0_35 = arith.constant 0 : index
    %c0_36 = arith.constant 0 : index
    %70 = vector.load %arg5[%c1_34, %c0_35, %c0_36] : memref<2x256x32xf32, #tpu.memory_space<vmem>>, vector<1x256x32xf32>
    %71 = vector.shape_cast %70 : vector<1x256x32xf32> to vector<256x32xf32>
    %72 = vector.shape_cast %69 : vector<256x32xf32> to vector<1x256x32xf32>
    tpu.vector_store %arg5[%c1_34, %c0_35, %c0_36], %72 {strides = array<i32>} : memref<2x256x32xf32, #tpu.memory_space<vmem>>, vector<1x256x32xf32>,
    return
  }
}

</mosaic_0001>

<bundles_post_ra>
// kernel: tpu_custom_call.1
= control target key start
LH: loop header
LB: loop body
LE: loop exit
PB: predicated region body
PF: predicated region fallthrough
CT: control target
= control target key end

     0   :  { %vm160_vm0 = vcmask 1042432   ;;  %vm63_vm1 = vcmask 23552   ;;  %vm409_vm2 = vcmask 1043456   ;;  %vm312_vm3 = vcmask 31744   ;;  %s3937_s1 = inlined_call_operand.vmem [shape: f32[3,4], index: 1, kind: input, shape index: {}]   ;;  %s3938_s0 = inlined_call_operand.vmem [shape: f32[2,256,3], index: 0, kind: input, shape index: {}]   ;;  %s3939_s2 = inlined_call_operand.vmem [shape: f32[1,4], index: 2, kind: input, shape index: {}]   ;;  %s3940_s3 = inlined_call_operand.vmem [shape: f32[4,32], index: 3, kind: input, shape index: {}]   ;;  %s3941_s4 = inlined_call_operand.vmem [shape: f32[3,1,32], index: 4, kind: input, shape index: {}]   ;;  %s3942_s5 = inlined_call_operand.vmem [shape: f32[2,256,32], index: 5, kind: output, shape index: {}]  }
   0x1   :  { %v20_v0 = vld [vmem:[%s3937_s1] sm:$0x7]  ;;  %v29_v3 = vld [vmem:[%s3938_s0 + $0x8] sm:$0xff]  ;;  %v30_v5 = vld [vmem:[%s3938_s0 + $0x10] sm:$0xff]  ;;  %vm526_vm4 = vcmask 261120  }
   0x2   :  { %v28_v1 = vld [vmem:[%s3938_s0] sm:$0xff]  ;;  %1709 = vmatpush.msk.msra.mxu0 %vm160_vm0, %v20_v0  ;;  %1807 = vmatpush.msk.msra.mxu2 %vm160_vm0, %v20_v0  ;;  %v1776_v4 = vld [vmem:[%s3938_s0 + $0x108] sm:$0xff]  ;;  %v1777_v6 = vld [vmem:[%s3938_s0 + $0x110] sm:$0xff] }
   0x3   :  { %v1775_v2 = vld [vmem:[%s3938_s0 + $0x100] sm:$0xff]  ;;  %1710 = vmatmul.msk.f32.vlgmr.msra.gmra.mxu0 %vm63_vm1, %v28_v1  ;;  %v31_v7 = vld [vmem:[%s3938_s0 + $0x18] sm:$0xff]  ;;  %v33_v11 = vld [vmem:[%s3938_s0 + $0x28] sm:$0xff] }
   0x4   :  { %1808 = vmatmul.msk.f32.vlgmr.msra.gmra.mxu2 %vm63_vm1, %v1775_v2  ;;  %v1778_v8 = vld [vmem:[%s3938_s0 + $0x118] sm:$0xff]  ;;  %v32_v9 = vld [vmem:[%s3938_s0 + $0x20] sm:$0xff]  ;;  %v1780_v12 = vld [vmem:[%s3938_s0 + $0x128] sm:$0xff] }
   0x5   :  { %v1779_v10 = vld [vmem:[%s3938_s0 + $0x120] sm:$0xff]  ;;  %v34_v13 = vld [vmem:[%s3938_s0 + $0x30] sm:$0xff]  ;;  %v35_v15 = vld [vmem:[%s3938_s0 + $0x38] sm:$0xff] }
   0x6   :  { %v1781_v14 = vld [vmem:[%s3938_s0 + $0x130] sm:$0xff]  ;;  %v1782_v16 = vld [vmem:[%s3938_s0 + $0x138] sm:$0xff]  ;;  %v36_v17 = vld [vmem:[%s3938_s0 + $0x40] sm:$0xff] }
   0x7   :  { %v1783_v18 = vld [vmem:[%s3938_s0 + $0x140] sm:$0xff]  ;;  %v37_v19 = vld [vmem:[%s3938_s0 + $0x48] sm:$0xff]  ;;  %v38_v21 = vld [vmem:[%s3938_s0 + $0x50] sm:$0xff] }
   0x8   :  { %v1784_v20 = vld [vmem:[%s3938_s0 + $0x148] sm:$0xff]  ;;  %v1785_v22 = vld [vmem:[%s3938_s0 + $0x150] sm:$0xff]  ;;  %v39_v23 = vld [vmem:[%s3938_s0 + $0x58] sm:$0xff] }
   0x9   :  { %v1786_v24 = vld [vmem:[%s3938_s0 + $0x158] sm:$0xff]  ;;  %v40_v25 = vld [vmem:[%s3938_s0 + $0x60] sm:$0xff]  ;;  %v41_v27 = vld [vmem:[%s3938_s0 + $0x68] sm:$0xff] }
   0xa   :  { %v1787_v26 = vld [vmem:[%s3938_s0 + $0x160] sm:$0xff]  ;;  %v1788_v28 = vld [vmem:[%s3938_s0 + $0x168] sm:$0xff]  ;;  %v42_v30 = vld [vmem:[%s3938_s0 + $0x70] sm:$0xff] }
   0xb   :  { %1711 = vmatmul.msk.f32.gmra.mxu0 %vm63_vm1, %v29_v3  ;;  %v22_v29 = vld [vmem:[%s3940_s3] sm:$0xf]  ;;  %v1789_v31 = vld [vmem:[%s3938_s0 + $0x170] sm:$0xff]  ;;  %v43_v32 = vld [vmem:[%s3938_s0 + $0x78] sm:$0xff] }
   0xc   :  { %1809 = vmatmul.msk.f32.gmra.mxu2 %vm63_vm1, %v1776_v4  ;;  %1742 = vmatpush.msk.msra.mxu1 %vm409_vm2, %v22_v29  ;;  %v1790_v33 = vld [vmem:[%s3938_s0 + $0x178] sm:$0xff]  ;;  %v2208_v34 = vld [vmem:[%s3939_s2] ss:$0 sm:$0xff]  ;;  %v45_v42 = vld [vmem:[%s3938_s0 + $0x88] sm:$0xff] }
   0xd   :  { %1840 = vmatpush.msk.msra.mxu3 %vm409_vm2, %v22_v29  ;;  %v44_v36 = vld [vmem:[%s3938_s0 + $0x80] sm:$0xff]  ;;  %v1792_v43 = vld [vmem:[%s3938_s0 + $0x188] sm:$0xff]  ;;  %v46_v50 = vld [vmem:[%s3938_s0 + $0x90] sm:$0xff] }
   0xe   :  { %v1791_v37 = vld [vmem:[%s3938_s0 + $0x180] sm:$0xff]  ;;  %v1793_v51 = vld [vmem:[%s3938_s0 + $0x190] sm:$0xff]  ;;  %v47_v58 = vld [vmem:[%s3938_s0 + $0x98] sm:$0xff] }
   0xf   :  { %v1794_v59 = vld [vmem:[%s3938_s0 + $0x198] sm:$0xff]  ;;  %v48_v2 = vld [vmem:[%s3938_s0 + $0xa0] sm:$0xff] }
  0x10   :  { %v1795_v3 = vld [vmem:[%s3938_s0 + $0x1a0] sm:$0xff] }
  0x13   :  { %1712 = vmatmul.msk.f32.gmra.mxu0 %vm63_vm1, %v30_v5 }
  0x14   :  { %1810 = vmatmul.msk.f32.gmra.mxu2 %vm63_vm1, %v1777_v6 }
  0x1b   :  { %1713 = vmatmul.msk.f32.gmra.mxu0 %vm63_vm1, %v31_v7 }
  0x1c   :  { %1811 = vmatmul.msk.f32.gmra.mxu2 %vm63_vm1, %v1778_v8 }
  0x23   :  { %1714 = vmatmul.msk.f32.gmra.mxu0 %vm63_vm1, %v32_v9 }
  0x24   :  { %1812 = vmatmul.msk.f32.gmra.mxu2 %vm63_vm1, %v1779_v10  ;;  %v49_v10 = vld [vmem:[%s3938_s0 + $0xa8] sm:$0xff] }
  0x2b   :  { %1715 = vmatmul.msk.f32.gmra.mxu0 %vm63_vm1, %v33_v11  ;;  %v1796_v11 = vld [vmem:[%s3938_s0 + $0x1a8] sm:$0xff] }
  0x2c   :  { %1813 = vmatmul.msk.f32.gmra.mxu2 %vm63_vm1, %v1780_v12 }
  0x33   :  { %1716 = vmatmul.msk.f32.gmra.mxu0 %vm63_vm1, %v34_v13 }
  0x34   :  { %1814 = vmatmul.msk.f32.gmra.mxu2 %vm63_vm1, %v1781_v14 }
  0x3b   :  { %1717 = vmatmul.msk.f32.gmra.mxu0 %vm63_vm1, %v35_v15 }
  0x3c   :  { %1815 = vmatmul.msk.f32.gmra.mxu2 %vm63_vm1, %v1782_v16 }
  0x43   :  { %1718 = vmatmul.msk.f32.gmra.mxu0 %vm63_vm1, %v36_v17 }
  0x44   :  { %1816 = vmatmul.msk.f32.gmra.mxu2 %vm63_vm1, %v1783_v18  ;;  %v50_v18 = vld [vmem:[%s3938_s0 + $0xb0] sm:$0xff] }
  0x4b   :  { %1719 = vmatmul.msk.f32.gmra.mxu0 %vm63_vm1, %v37_v19  ;;  %v1797_v19 = vld [vmem:[%s3938_s0 + $0x1b0] sm:$0xff] }
  0x4c   :  { %1817 = vmatmul.msk.f32.gmra.mxu2 %vm63_vm1, %v1784_v20 }
  0x53   :  { %1720 = vmatmul.msk.f32.gmra.mxu0 %vm63_vm1, %v38_v21 }
  0x54   :  { %1818 = vmatmul.msk.f32.gmra.mxu2 %vm63_vm1, %v1785_v22 }
  0x5b   :  { %1721 = vmatmul.msk.f32.gmra.mxu0 %vm63_vm1, %v39_v23 }
  0x5c   :  { %1819 = vmatmul.msk.f32.gmra.mxu2 %vm63_vm1, %v1786_v24 }
  0x63   :  { %1722 = vmatmul.msk.f32.gmra.mxu0 %vm63_vm1, %v40_v25 }
  0x64   :  { %1820 = vmatmul.msk.f32.gmra.mxu2 %vm63_vm1, %v1787_v26  ;;  %v51_v26 = vld [vmem:[%s3938_s0 + $0xb8] sm:$0xff] }
  0x6b   :  { %1723 = vmatmul.msk.f32.gmra.mxu0 %vm63_vm1, %v41_v27  ;;  %v1798_v27 = vld [vmem:[%s3938_s0 + $0x1b8] sm:$0xff] }
  0x6c   :  { %1821 = vmatmul.msk.f32.gmra.mxu2 %vm63_vm1, %v1788_v28 }
  0x73   :  { %1724 = vmatmul.msk.f32.gmra.mxu0 %vm63_vm1, %v42_v30 }
  0x74   :  { %1822 = vmatmul.msk.f32.gmra.mxu2 %vm63_vm1, %v1789_v31 }
  0x7b   :  { %1725 = vmatmul.msk.f32.gmra.mxu0 %vm63_vm1, %v43_v32 }
  0x7c   :  { %1823 = vmatmul.msk.f32.gmra.mxu2 %vm63_vm1, %v1790_v33 }
  0x80   :  { %v181_v35 = vpop.f32.mrf.mxu0 }
  0x81   :  { %v182_v38 = vadd.f32 %v2208_v34, %v181_v35  ;;  %v52_v35 = vld [vmem:[%s3938_s0 + $0xc0] sm:$0xff] }
  0x83   :  { %1909 = vtanh.f32 %v182_v38  ;;  %1726 = vmatmul.msk.f32.gmra.mxu0 %vm63_vm1, %v44_v36  ;;  %v1799_v36 = vld [vmem:[%s3938_s0 + $0x1c0] sm:$0xff] }
  0x84   :  { %1824 = vmatmul.msk.f32.gmra.mxu2 %vm63_vm1, %v1791_v37 }
  0x87   :  { %v1022_v39 = vpop.f32.mrf.mxu2 }
  0x88   :  { %v1023_v40 = vadd.f32 %v2208_v34, %v1022_v39  ;;  %v184_v41 = vpop.f32.mrf.mxu0 }
  0x89   :  { %v1910_v44 = vpop.eup %1909  ;;  %v185_v45 = vadd.f32 %v2208_v34, %v184_v41 }
  0x8a   :  { %1911 = vtanh.f32 %v1023_v40  ;;  %1743 = vmatmul.msk.f32.vlgmr.msra.gmra.mxu1 %vm312_vm3, %v1910_v44  ;;  %v1800_v44 = vld [vmem:[%s3938_s0 + $0x1c8] sm:$0xff] }
  0x8b   :  { %1913 = vtanh.f32 %v185_v45  ;;  %1727 = vmatmul.msk.f32.gmra.mxu0 %vm63_vm1, %v45_v42 }
  0x8c   :  { %1825 = vmatmul.msk.f32.gmra.mxu2 %vm63_vm1, %v1792_v43  ;;  %v53_v43 = vld [vmem:[%s3938_s0 + $0xc8] sm:$0xff] }
  0x8f   :  { %v1025_v46 = vpop.f32.mrf.mxu2 }
  0x90   :  { %v1912_v47 = vpop.eup %1911  ;;  %v1026_v48 = vadd.f32 %v2208_v34, %v1025_v46  ;;  %v187_v49 = vpop.f32.mrf.mxu0 }
  0x91   :  { %1841 = vmatmul.msk.f32.vlgmr.msra.gmra.mxu3 %vm312_vm3, %v1912_v47  ;;  %v1914_v52 = vpop.eup %1913  ;;  %v188_v53 = vadd.f32 %v2208_v34, %v187_v49 }
  0x92   :  { %1915 = vtanh.f32 %v1026_v48  ;;  %1744 = vmatmul.msk.f32.gmra.mxu1 %vm312_vm3, %v1914_v52  ;;  %v1801_v52 = vld [vmem:[%s3938_s0 + $0x1d0] sm:$0xff] }
  0x93   :  { %1917 = vtanh.f32 %v188_v53  ;;  %1728 = vmatmul.msk.f32.gmra.mxu0 %vm63_vm1, %v46_v50 }
  0x94   :  { %1826 = vmatmul.msk.f32.gmra.mxu2 %vm63_vm1, %v1793_v51  ;;  %v54_v51 = vld [vmem:[%s3938_s0 + $0xd0] sm:$0xff] }
  0x97   :  { %v1028_v54 = vpop.f32.mrf.mxu2 }
  0x98   :  { %v1916_v55 = vpop.eup %1915  ;;  %v1029_v56 = vadd.f32 %v2208_v34, %v1028_v54  ;;  %v190_v57 = vpop.f32.mrf.mxu0 }
  0x99   :  { %1842 = vmatmul.msk.f32.gmra.mxu3 %vm312_vm3, %v1916_v55  ;;  %v1918_v60 = vpop.eup %1917  ;;  %v191_v61 = vadd.f32 %v2208_v34, %v190_v57 }
  0x9a   :  { %1919 = vtanh.f32 %v1029_v56  ;;  %1745 = vmatmul.msk.f32.gmra.mxu1 %vm312_vm3, %v1918_v60  ;;  %v1802_v60 = vld [vmem:[%s3938_s0 + $0x1d8] sm:$0xff] }
  0x9b   :  { %1921 = vtanh.f32 %v191_v61  ;;  %1729 = vmatmul.msk.f32.gmra.mxu0 %vm63_vm1, %v47_v58 }
  0x9c   :  { %1827 = vmatmul.msk.f32.gmra.mxu2 %vm63_vm1, %v1794_v59  ;;  %v55_v59 = vld [vmem:[%s3938_s0 + $0xd8] sm:$0xff] }
  0x9f   :  { %v1031_v62 = vpop.f32.mrf.mxu2 }
  0xa0   :  { %v1920_v63 = vpop.eup %1919  ;;  %v1032_v0 = vadd.f32 %v2208_v34, %v1031_v62  ;;  %v193_v1 = vpop.f32.mrf.mxu0 }
  0xa1   :  { %1843 = vmatmul.msk.f32.gmra.mxu3 %vm312_vm3, %v1920_v63  ;;  %v1922_v4 = vpop.eup %1921  ;;  %v194_v5 = vadd.f32 %v2208_v34, %v193_v1 }
  0xa2   :  { %1923 = vtanh.f32 %v1032_v0  ;;  %1746 = vmatmul.msk.f32.gmra.mxu1 %vm312_vm3, %v1922_v4  ;;  %v1803_v4 = vld [vmem:[%s3938_s0 + $0x1e0] sm:$0xff] }
  0xa3   :  { %1925 = vtanh.f32 %v194_v5  ;;  %1730 = vmatmul.msk.f32.gmra.mxu0 %vm63_vm1, %v48_v2 }
  0xa4   :  { %1828 = vmatmul.msk.f32.gmra.mxu2 %vm63_vm1, %v1795_v3  ;;  %v56_v3 = vld [vmem:[%s3938_s0 + $0xe0] sm:$0xff] }
  0xa7   :  { %v1034_v6 = vpop.f32.mrf.mxu2 }
  0xa8   :  { %v1924_v7 = vpop.eup %1923  ;;  %v1035_v8 = vadd.f32 %v2208_v34, %v1034_v6  ;;  %v196_v9 = vpop.f32.mrf.mxu0 }
  0xa9   :  { %1844 = vmatmul.msk.f32.gmra.mxu3 %vm312_vm3, %v1924_v7  ;;  %v1926_v12 = vpop.eup %1925  ;;  %v197_v13 = vadd.f32 %v2208_v34, %v196_v9 }
  0xaa   :  { %1927 = vtanh.f32 %v1035_v8  ;;  %1747 = vmatmul.msk.f32.gmra.mxu1 %vm312_vm3, %v1926_v12  ;;  %v1804_v12 = vld [vmem:[%s3938_s0 + $0x1e8] sm:$0xff] }
  0xab   :  { %1929 = vtanh.f32 %v197_v13  ;;  %1731 = vmatmul.msk.f32.gmra.mxu0 %vm63_vm1, %v49_v10 }
  0xac   :  { %1829 = vmatmul.msk.f32.gmra.mxu2 %vm63_vm1, %v1796_v11  ;;  %v57_v11 = vld [vmem:[%s3938_s0 + $0xe8] sm:$0xff] }
  0xaf   :  { %v1037_v14 = vpop.f32.mrf.mxu2 }
  0xb0   :  { %v1928_v15 = vpop.eup %1927  ;;  %v1038_v16 = vadd.f32 %v2208_v34, %v1037_v14  ;;  %v199_v17 = vpop.f32.mrf.mxu0 }
  0xb1   :  { %1845 = vmatmul.msk.f32.gmra.mxu3 %vm312_vm3, %v1928_v15  ;;  %v1930_v20 = vpop.eup %1929  ;;  %v200_v21 = vadd.f32 %v2208_v34, %v199_v17 }
  0xb2   :  { %1931 = vtanh.f32 %v1038_v16  ;;  %1748 = vmatmul.msk.f32.gmra.mxu1 %vm312_vm3, %v1930_v20  ;;  %v1805_v20 = vld [vmem:[%s3938_s0 + $0x1f0] sm:$0xff] }
  0xb3   :  { %1933 = vtanh.f32 %v200_v21  ;;  %1732 = vmatmul.msk.f32.gmra.mxu0 %vm63_vm1, %v50_v18 }
  0xb4   :  { %1830 = vmatmul.msk.f32.gmra.mxu2 %vm63_vm1, %v1797_v19  ;;  %v58_v19 = vld [vmem:[%s3938_s0 + $0xf0] sm:$0xff] }
  0xb7   :  { %v1040_v22 = vpop.f32.mrf.mxu2 }
  0xb8   :  { %v1932_v23 = vpop.eup %1931  ;;  %v1041_v24 = vadd.f32 %v2208_v34, %v1040_v22  ;;  %v202_v25 = vpop.f32.mrf.mxu0 }
  0xb9   :  { %1846 = vmatmul.msk.f32.gmra.mxu3 %vm312_vm3, %v1932_v23  ;;  %v1934_v28 = vpop.eup %1933  ;;  %v203_v29 = vadd.f32 %v2208_v34, %v202_v25 }
  0xba   :  { %1935 = vtanh.f32 %v1041_v24  ;;  %1749 = vmatmul.msk.f32.gmra.mxu1 %vm312_vm3, %v1934_v28  ;;  %v1806_v28 = vld [vmem:[%s3938_s0 + $0x1f8] sm:$0xff] }
  0xbb   :  { %1937 = vtanh.f32 %v203_v29  ;;  %1733 = vmatmul.msk.f32.gmra.mxu0 %vm63_vm1, %v51_v26 }
  0xbc   :  { %1831 = vmatmul.msk.f32.gmra.mxu2 %vm63_vm1, %v1798_v27  ;;  %v59_v27 = vld [vmem:[%s3938_s0 + $0xf8] sm:$0xff] }
  0xbf   :  { %v1043_v30 = vpop.f32.mrf.mxu2 }
  0xc0   :  { %v1936_v31 = vpop.eup %1935  ;;  %v1044_v32 = vadd.f32 %v2208_v34, %v1043_v30  ;;  %v205_v33 = vpop.f32.mrf.mxu0 }
  0xc1   :  { %1847 = vmatmul.msk.f32.gmra.mxu3 %vm312_vm3, %v1936_v31  ;;  %v1938_v37 = vpop.eup %1937  ;;  %v206_v38 = vadd.f32 %v2208_v34, %v205_v33 }
  0xc2   :  { %1939 = vtanh.f32 %v1044_v32  ;;  %1750 = vmatmul.msk.f32.gmra.mxu1 %vm312_vm3, %v1938_v37 }
  0xc3   :  { %1941 = vtanh.f32 %v206_v38  ;;  %1734 = vmatmul.msk.f32.gmra.mxu0 %vm63_vm1, %v52_v35 }
  0xc4   :  { %1832 = vmatmul.msk.f32.gmra.mxu2 %vm63_vm1, %v1799_v36 }
  0xc7   :  { %v1046_v39 = vpop.f32.mrf.mxu2 }
  0xc8   :  { %v1940_v40 = vpop.eup %1939  ;;  %v1047_v41 = vadd.f32 %v2208_v34, %v1046_v39  ;;  %v208_v42 = vpop.f32.mrf.mxu0 }
  0xc9   :  { %1848 = vmatmul.msk.f32.gmra.mxu3 %vm312_vm3, %v1940_v40  ;;  %v1942_v45 = vpop.eup %1941  ;;  %v209_v46 = vadd.f32 %v2208_v34, %v208_v42 }
  0xca   :  { %1943 = vtanh.f32 %v1047_v41  ;;  %1751 = vmatmul.msk.f32.gmra.mxu1 %vm312_vm3, %v1942_v45 }
  0xcb   :  { %1945 = vtanh.f32 %v209_v46  ;;  %1735 = vmatmul.msk.f32.gmra.mxu0 %vm63_vm1, %v53_v43 }
  0xcc   :  { %1833 = vmatmul.msk.f32.gmra.mxu2 %vm63_vm1, %v1800_v44 }
  0xcf   :  { %v1049_v47 = vpop.f32.mrf.mxu2 }
  0xd0   :  { %v1944_v48 = vpop.eup %1943  ;;  %v1050_v49 = vadd.f32 %v2208_v34, %v1049_v47  ;;  %v211_v50 = vpop.f32.mrf.mxu0 }
  0xd1   :  { %1849 = vmatmul.msk.f32.gmra.mxu3 %vm312_vm3, %v1944_v48  ;;  %v1946_v53 = vpop.eup %1945  ;;  %v212_v54 = vadd.f32 %v2208_v34, %v211_v50 }
  0xd2   :  { %1947 = vtanh.f32 %v1050_v49  ;;  %1752 = vmatmul.msk.f32.gmra.mxu1 %vm312_vm3, %v1946_v53 }
  0xd3   :  { %1949 = vtanh.f32 %v212_v54  ;;  %1736 = vmatmul.msk.f32.gmra.mxu0 %vm63_vm1, %v54_v51 }
  0xd4   :  { %1834 = vmatmul.msk.f32.gmra.mxu2 %vm63_vm1, %v1801_v52 }
  0xd7   :  { %v1052_v55 = vpop.f32.mrf.mxu2 }
  0xd8   :  { %v1948_v56 = vpop.eup %1947  ;;  %v1053_v57 = vadd.f32 %v2208_v34, %v1052_v55  ;;  %v214_v58 = vpop.f32.mrf.mxu0 }
  0xd9   :  { %1850 = vmatmul.msk.f32.gmra.mxu3 %vm312_vm3, %v1948_v56  ;;  %v1950_v61 = vpop.eup %1949  ;;  %v215_v62 = vadd.f32 %v2208_v34, %v214_v58 }
  0xda   :  { %1951 = vtanh.f32 %v1053_v57  ;;  %1753 = vmatmul.msk.f32.gmra.mxu1 %vm312_vm3, %v1950_v61 }
  0xdb   :  { %1953 = vtanh.f32 %v215_v62  ;;  %1737 = vmatmul.msk.f32.gmra.mxu0 %vm63_vm1, %v55_v59 }
  0xdc   :  { %1835 = vmatmul.msk.f32.gmra.mxu2 %vm63_vm1, %v1802_v60 }
  0xdf   :  { %v1055_v63 = vpop.f32.mrf.mxu2 }
  0xe0   :  { %v1952_v0 = vpop.eup %1951  ;;  %v1056_v1 = vadd.f32 %v2208_v34, %v1055_v63  ;;  %v217_v2 = vpop.f32.mrf.mxu0 }
  0xe1   :  { %1851 = vmatmul.msk.f32.gmra.mxu3 %vm312_vm3, %v1952_v0  ;;  %v1954_v5 = vpop.eup %1953  ;;  %v218_v6 = vadd.f32 %v2208_v34, %v217_v2 }
  0xe2   :  { %1955 = vtanh.f32 %v1056_v1  ;;  %1754 = vmatmul.msk.f32.gmra.mxu1 %vm312_vm3, %v1954_v5 }
  0xe3   :  { %1957 = vtanh.f32 %v218_v6  ;;  %1738 = vmatmul.msk.f32.gmra.mxu0 %vm63_vm1, %v56_v3 }
  0xe4   :  { %1836 = vmatmul.msk.f32.gmra.mxu2 %vm63_vm1, %v1803_v4 }
  0xe7   :  { %v1058_v7 = vpop.f32.mrf.mxu2 }
  0xe8   :  { %v1956_v8 = vpop.eup %1955  ;;  %v1059_v9 = vadd.f32 %v2208_v34, %v1058_v7  ;;  %v220_v10 = vpop.f32.mrf.mxu0 }
  0xe9   :  { %1852 = vmatmul.msk.f32.gmra.mxu3 %vm312_vm3, %v1956_v8  ;;  %v1958_v13 = vpop.eup %1957  ;;  %v221_v14 = vadd.f32 %v2208_v34, %v220_v10 }
  0xea   :  { %1959 = vtanh.f32 %v1059_v9  ;;  %1755 = vmatmul.msk.f32.gmra.mxu1 %vm312_vm3, %v1958_v13 }
  0xeb   :  { %1961 = vtanh.f32 %v221_v14  ;;  %1739 = vmatmul.msk.f32.gmra.mxu0 %vm63_vm1, %v57_v11 }
  0xec   :  { %1837 = vmatmul.msk.f32.gmra.mxu2 %vm63_vm1, %v1804_v12 }
  0xef   :  { %v1061_v15 = vpop.f32.mrf.mxu2 }
  0xf0   :  { %v1960_v16 = vpop.eup %1959  ;;  %v1062_v17 = vadd.f32 %v2208_v34, %v1061_v15  ;;  %v223_v18 = vpop.f32.mrf.mxu0 }
  0xf1   :  { %1853 = vmatmul.msk.f32.gmra.mxu3 %vm312_vm3, %v1960_v16  ;;  %v1962_v21 = vpop.eup %1961  ;;  %v224_v22 = vadd.f32 %v2208_v34, %v223_v18 }
  0xf2   :  { %1963 = vtanh.f32 %v1062_v17  ;;  %1756 = vmatmul.msk.f32.gmra.mxu1 %vm312_vm3, %v1962_v21 }
  0xf3   :  { %1965 = vtanh.f32 %v224_v22  ;;  %1740 = vmatmul.msk.f32.gmra.mxu0 %vm63_vm1, %v58_v19 }
  0xf4   :  { %1838 = vmatmul.msk.f32.gmra.mxu2 %vm63_vm1, %v1805_v20 }
  0xf7   :  { %v1064_v23 = vpop.f32.mrf.mxu2 }
  0xf8   :  { %v1964_v24 = vpop.eup %1963  ;;  %v1065_v25 = vadd.f32 %v2208_v34, %v1064_v23  ;;  %v226_v26 = vpop.f32.mrf.mxu0 }
  0xf9   :  { %1854 = vmatmul.msk.f32.gmra.mxu3 %vm312_vm3, %v1964_v24  ;;  %v1966_v29 = vpop.eup %1965  ;;  %v227_v30 = vadd.f32 %v2208_v34, %v226_v26 }
  0xfa   :  { %1967 = vtanh.f32 %v1065_v25  ;;  %1757 = vmatmul.msk.f32.gmra.mxu1 %vm312_vm3, %v1966_v29 }
  0xfb   :  { %1969 = vtanh.f32 %v227_v30  ;;  %1741 = vmatmul.msk.f32.gmra.mxu0 %vm63_vm1, %v59_v27 }
  0xfc   :  { %1839 = vmatmul.msk.f32.gmra.mxu2 %vm63_vm1, %v1806_v28 }
  0xff   :  { %v1067_v31 = vpop.f32.mrf.mxu2 }
 0x100   :  { %v1968_v32 = vpop.eup %1967  ;;  %v1068_v33 = vadd.f32 %v2208_v34, %v1067_v31  ;;  %v229_v35 = vpop.f32.mrf.mxu0 }
 0x101   :  { %1855 = vmatmul.msk.f32.gmra.mxu3 %vm312_vm3, %v1968_v32  ;;  %v1970_v36 = vpop.eup %1969  ;;  %v230_v37 = vadd.f32 %v2208_v34, %v229_v35 }
 0x102   :  { %1971 = vtanh.f32 %v1068_v33  ;;  %1758 = vmatmul.msk.f32.gmra.mxu1 %vm312_vm3, %v1970_v36 }
 0x103   :  { %1973 = vtanh.f32 %v230_v37 }
 0x107   :  { %v1070_v38 = vpop.f32.mrf.mxu2  ;;  %v2403_v41 = vpop.f32.mrf.mxu1 }
 0x108   :  { %v1972_v39 = vpop.eup %1971  ;;  %v1071_v40 = vadd.f32 %v2208_v34, %v1070_v38  ;;  %v232_v42 = vpop.f32.mrf.mxu0 }
 0x109   :  { %1856 = vmatmul.msk.f32.gmra.mxu3 %vm312_vm3, %v1972_v39  ;;  %v1974_v43 = vpop.eup %1973  ;;  %v233_v44 = vadd.f32 %v2208_v34, %v232_v42 }
 0x10a   :  { %1975 = vtanh.f32 %v1071_v40  ;;  %1759 = vmatmul.msk.f32.gmra.mxu1 %vm312_vm3, %v1974_v43 }
 0x10b   :  { %1977 = vtanh.f32 %v233_v44 }
 0x10f   :  { %v1073_v45 = vpop.f32.mrf.mxu2  ;;  %v2409_v48 = vpop.f32.mrf.mxu1 }
 0x110   :  { %v1976_v46 = vpop.eup %1975  ;;  %v1074_v47 = vadd.f32 %v2208_v34, %v1073_v45  ;;  %v235_v49 = vpop.f32.mrf.mxu0 }
 0x111   :  { %1857 = vmatmul.msk.f32.gmra.mxu3 %vm312_vm3, %v1976_v46  ;;  %v1978_v50 = vpop.eup %1977  ;;  %v236_v51 = vadd.f32 %v2208_v34, %v235_v49 }
 0x112   :  { %1979 = vtanh.f32 %v1074_v47  ;;  %1760 = vmatmul.msk.f32.gmra.mxu1 %vm312_vm3, %v1978_v50 }
 0x113   :  { %1981 = vtanh.f32 %v236_v51 }
 0x114   :  { %v2414_v52 = vpop.f32.mrf.mxu3 }
 0x117   :  { %v1076_v53 = vpop.f32.mrf.mxu2  ;;  %v2417_v56 = vpop.f32.mrf.mxu1 }
 0x118   :  { %v1980_v54 = vpop.eup %1979  ;;  %v1077_v55 = vadd.f32 %v2208_v34, %v1076_v53  ;;  %v238_v57 = vpop.f32.mrf.mxu0 }
 0x119   :  { %1858 = vmatmul.msk.f32.gmra.mxu3 %vm312_vm3, %v1980_v54  ;;  %v1982_v58 = vpop.eup %1981  ;;  %v239_v59 = vadd.f32 %v2208_v34, %v238_v57 }
 0x11a   :  { %1983 = vtanh.f32 %v1077_v55  ;;  %1761 = vmatmul.msk.f32.gmra.mxu1 %vm312_vm3, %v1982_v58 }
 0x11b   :  { %1985 = vtanh.f32 %v239_v59 }
 0x11c   :  { %v2422_v60 = vpop.f32.mrf.mxu3 }
 0x11f   :  { %v1079_v61 = vpop.f32.mrf.mxu2  ;;  %v2425_v0 = vpop.f32.mrf.mxu1 }
 0x120   :  { %v1984_v62 = vpop.eup %1983  ;;  %v1080_v63 = vadd.f32 %v2208_v34, %v1079_v61  ;;  %v241_v1 = vpop.f32.mrf.mxu0 }
 0x121   :  { %1859 = vmatmul.msk.f32.gmra.mxu3 %vm312_vm3, %v1984_v62  ;;  %v1986_v2 = vpop.eup %1985  ;;  %v242_v3 = vadd.f32 %v2208_v34, %v241_v1 }
 0x122   :  { %1987 = vtanh.f32 %v1080_v63  ;;  %1762 = vmatmul.msk.f32.gmra.mxu1 %vm312_vm3, %v1986_v2 }
 0x123   :  { %1989 = vtanh.f32 %v242_v3 }
 0x124   :  { %v2430_v4 = vpop.f32.mrf.mxu3 }
 0x127   :  { %v1082_v5 = vpop.f32.mrf.mxu2  ;;  %v2433_v8 = vpop.f32.mrf.mxu1 }
 0x128   :  { %v1988_v6 = vpop.eup %1987  ;;  %v1083_v7 = vadd.f32 %v2208_v34, %v1082_v5  ;;  %v244_v9 = vpop.f32.mrf.mxu0 }
 0x129   :  { %1860 = vmatmul.msk.f32.gmra.mxu3 %vm312_vm3, %v1988_v6  ;;  %v1990_v10 = vpop.eup %1989  ;;  %v245_v11 = vadd.f32 %v2208_v34, %v244_v9 }
 0x12a   :  { %1991 = vtanh.f32 %v1083_v7  ;;  %1763 = vmatmul.msk.f32.gmra.mxu1 %vm312_vm3, %v1990_v10 }
 0x12b   :  { %1993 = vtanh.f32 %v245_v11 }
 0x12c   :  { %v2438_v12 = vpop.f32.mrf.mxu3 }
 0x12f   :  { %v1085_v13 = vpop.f32.mrf.mxu2  ;;  %v2441_v16 = vpop.f32.mrf.mxu1 }
 0x130   :  { %v1992_v14 = vpop.eup %1991  ;;  %v1086_v15 = vadd.f32 %v2208_v34, %v1085_v13  ;;  %v247_v17 = vpop.f32.mrf.mxu0 }
 0x131   :  { %1861 = vmatmul.msk.f32.gmra.mxu3 %vm312_vm3, %v1992_v14  ;;  %v1994_v18 = vpop.eup %1993  ;;  %v248_v19 = vadd.f32 %v2208_v34, %v247_v17 }
 0x132   :  { %1995 = vtanh.f32 %v1086_v15  ;;  %1764 = vmatmul.msk.f32.gmra.mxu1 %vm312_vm3, %v1994_v18 }
 0x133   :  { %1997 = vtanh.f32 %v248_v19 }
 0x134   :  { %v2446_v20 = vpop.f32.mrf.mxu3 }
 0x137   :  { %v1088_v21 = vpop.f32.mrf.mxu2  ;;  %v2449_v24 = vpop.f32.mrf.mxu1 }
 0x138   :  { %v1996_v22 = vpop.eup %1995  ;;  %v1089_v23 = vadd.f32 %v2208_v34, %v1088_v21  ;;  %v250_v25 = vpop.f32.mrf.mxu0 }
 0x139   :  { %1862 = vmatmul.msk.f32.gmra.mxu3 %vm312_vm3, %v1996_v22  ;;  %v1998_v26 = vpop.eup %1997  ;;  %v251_v27 = vadd.f32 %v2208_v34, %v250_v25 }
 0x13a   :  { %1999 = vtanh.f32 %v1089_v23  ;;  %1765 = vmatmul.msk.f32.gmra.mxu1 %vm312_vm3, %v1998_v26 }
 0x13b   :  { %2001 = vtanh.f32 %v251_v27 }
 0x13c   :  { %v2454_v28 = vpop.f32.mrf.mxu3 }
 0x13f   :  { %v1091_v29 = vpop.f32.mrf.mxu2  ;;  %v2457_v32 = vpop.f32.mrf.mxu1 }
 0x140   :  { %v2000_v30 = vpop.eup %1999  ;;  %v1092_v31 = vadd.f32 %v2208_v34, %v1091_v29  ;;  %v253_v33 = vpop.f32.mrf.mxu0 }
 0x141   :  { %1863 = vmatmul.msk.f32.gmra.mxu3 %vm312_vm3, %v2000_v30  ;;  %v2002_v35 = vpop.eup %2001  ;;  %v254_v36 = vadd.f32 %v2208_v34, %v253_v33 }
 0x142   :  { %2003 = vtanh.f32 %v1092_v31  ;;  %1766 = vmatmul.msk.f32.gmra.mxu1 %vm312_vm3, %v2002_v35 }
 0x143   :  { %2005 = vtanh.f32 %v254_v36 }
 0x144   :  { %v2462_v37 = vpop.f32.mrf.mxu3 }
 0x147   :  { %v1094_v38 = vpop.f32.mrf.mxu2  ;;  %v2465_v42 = vpop.f32.mrf.mxu1 }
 0x148   :  { %v2004_v39 = vpop.eup %2003  ;;  %v1095_v40 = vadd.f32 %v2208_v34, %v1094_v38  ;;  %v256_v43 = vpop.f32.mrf.mxu0 }
 0x149   :  { %1864 = vmatmul.msk.f32.gmra.mxu3 %vm312_vm3, %v2004_v39  ;;  %v2006_v44 = vpop.eup %2005  ;;  %v257_v45 = vadd.f32 %v2208_v34, %v256_v43 }
 0x14a   :  { %2007 = vtanh.f32 %v1095_v40  ;;  %1767 = vmatmul.msk.f32.gmra.mxu1 %vm312_vm3, %v2006_v44 }
 0x14b   :  { %2009 = vtanh.f32 %v257_v45 }
 0x14c   :  { %v2470_v46 = vpop.f32.mrf.mxu3 }
 0x14f   :  { %v1097_v47 = vpop.f32.mrf.mxu2  ;;  %v2473_v51 = vpop.f32.mrf.mxu1 }
 0x150   :  { %v2008_v49 = vpop.eup %2007  ;;  %v1098_v50 = vadd.f32 %v2208_v34, %v1097_v47  ;;  %v259_v53 = vpop.f32.mrf.mxu0 }
 0x151   :  { %1865 = vmatmul.msk.f32.gmra.mxu3 %vm312_vm3, %v2008_v49  ;;  %v2010_v54 = vpop.eup %2009  ;;  %v260_v55 = vadd.f32 %v2208_v34, %v259_v53 }
 0x152   :  { %2011 = vtanh.f32 %v1098_v50  ;;  %1768 = vmatmul.msk.f32.gmra.mxu1 %vm312_vm3, %v2010_v54 }
 0x153   :  { %2013 = vtanh.f32 %v260_v55 }
 0x154   :  { %v2478_v57 = vpop.f32.mrf.mxu3 }
 0x157   :  { %v1100_v58 = vpop.f32.mrf.mxu2  ;;  %v2481_v62 = vpop.f32.mrf.mxu1 }
 0x158   :  { %v2012_v59 = vpop.eup %2011  ;;  %v1101_v61 = vadd.f32 %v2208_v34, %v1100_v58  ;;  %v262_v63 = vpop.f32.mrf.mxu0 }
 0x159   :  { %1866 = vmatmul.msk.f32.gmra.mxu3 %vm312_vm3, %v2012_v59  ;;  %v2014_v1 = vpop.eup %2013  ;;  %v263_v2 = vadd.f32 %v2208_v34, %v262_v63 }
 0x15a   :  { %2015 = vtanh.f32 %v1101_v61  ;;  %1769 = vmatmul.msk.f32.gmra.mxu1 %vm312_vm3, %v2014_v1 }
 0x15b   :  { %2017 = vtanh.f32 %v263_v2 }
 0x15c   :  { %v2486_v3 = vpop.f32.mrf.mxu3 }
 0x15f   :  { %v1103_v5 = vpop.f32.mrf.mxu2  ;;  %v2489_v9 = vpop.f32.mrf.mxu1 }
 0x160   :  { %v2016_v6 = vpop.eup %2015  ;;  %v1104_v7 = vadd.f32 %v2208_v34, %v1103_v5  ;;  %v265_v10 = vpop.f32.mrf.mxu0 }
 0x161   :  { %1867 = vmatmul.msk.f32.gmra.mxu3 %vm312_vm3, %v2016_v6  ;;  %v2018_v11 = vpop.eup %2017  ;;  %v266_v13 = vadd.f32 %v2208_v34, %v265_v10 }
 0x162   :  { %2019 = vtanh.f32 %v1104_v7  ;;  %1770 = vmatmul.msk.f32.gmra.mxu1 %vm312_vm3, %v2018_v11 }
 0x163   :  { %2021 = vtanh.f32 %v266_v13 }
 0x164   :  { %v2494_v14 = vpop.f32.mrf.mxu3 }
 0x167   :  { %v1106_v15 = vpop.f32.mrf.mxu2  ;;  %v2497_v19 = vpop.f32.mrf.mxu1 }
 0x168   :  { %v2020_v17 = vpop.eup %2019  ;;  %v1107_v18 = vadd.f32 %v2208_v34, %v1106_v15  ;;  %v268_v21 = vpop.f32.mrf.mxu0 }
 0x169   :  { %1868 = vmatmul.msk.f32.gmra.mxu3 %vm312_vm3, %v2020_v17  ;;  %v2022_v22 = vpop.eup %2021  ;;  %v269_v23 = vadd.f32 %v2208_v34, %v268_v21  ;;  %v2557_v21 = vld [vmem:[%s3941_s4] ss:$0 sm:$0xff] }
 0x16a   :  { %2023 = vtanh.f32 %v1107_v18  ;;  %1771 = vmatmul.msk.f32.gmra.mxu1 %vm312_vm3, %v2022_v22 }
 0x16b   :  { %2025 = vtanh.f32 %v269_v23  ;;  %v2563_v23 = vadd.f32 %v2557_v21, %v2403_v41 }
 0x16c   :  { %v2502_v25 = vpop.f32.mrf.mxu3 }
 0x16f   :  { %v1109_v26 = vpop.f32.mrf.mxu2  ;;  %v2505_v30 = vpop.f32.mrf.mxu1 }
 0x170   :  { %v2024_v27 = vpop.eup %2023  ;;  %v1110_v29 = vadd.f32 %v2208_v34, %v1109_v26  ;;  %v271_v31 = vpop.f32.mrf.mxu0  ;;  %v2567_v26 = vadd.f32 %v2557_v21, %v2409_v48 }
 0x171   :  { %1869 = vmatmul.msk.f32.gmra.mxu3 %vm312_vm3, %v2024_v27  ;;  %v2026_v33 = vpop.eup %2025  ;;  %v272_v35 = vadd.f32 %v2208_v34, %v271_v31  ;;  %v2571_v27 = vadd.f32 %v2557_v21, %v2417_v56 }
 0x172   :  { %2027 = vtanh.f32 %v1110_v29  ;;  %1772 = vmatmul.msk.f32.gmra.mxu1 %vm312_vm3, %v2026_v33  ;;  %v527_v29 = vsel %vm526_vm4, %v2563_v23, 0.0  ;;  %v528_v31 = vsel %vm526_vm4, %v2567_v26, 0.0  ;;  %v2579_v33 = vadd.f32 %v2557_v21, %v2425_v0 }
 0x173   :  { %2029 = vtanh.f32 %v272_v35  ;;  %v530_v48 = vsel %vm526_vm4, %v2571_v27, 0.0  ;;  %v2587_v35 = vadd.f32 %v2557_v21, %v2433_v8  ;;  %v529_v56 = vadd.f32 %v528_v31, %v527_v29 }
 0x174   :  { %v2510_v36 = vpop.f32.mrf.mxu3  ;;  %v2621_v31 = vadd.f32 %v2557_v21, %v2473_v51 }
 0x175   :  { %v531_v0 = vadd.f32 %v530_v48, %v529_v56  ;;  %v2627_v56 = vadd.f32 %v2557_v21, %v2481_v62 }
 0x177   :  { %v1112_v38 = vpop.f32.mrf.mxu2  ;;  %v2513_v43 = vpop.f32.mrf.mxu1  ;;  %v546_v51 = vsel %vm526_vm4, %v2627_v56, 0.0 }
 0x178   :  { %v2028_v39 = vpop.eup %2027  ;;  %v1113_v40 = vadd.f32 %v2208_v34, %v1112_v38  ;;  %v274_v44 = vpop.f32.mrf.mxu0 }
 0x179   :  { %1870 = vmatmul.msk.f32.gmra.mxu3 %vm312_vm3, %v2028_v39  ;;  %v2030_v45 = vpop.eup %2029  ;;  %v275_v47 = vadd.f32 %v2208_v34, %v274_v44  ;;  %v532_v39 = vsel %vm526_vm4, %v2579_v33, 0.0  ;;  %v534_v44 = vsel %vm526_vm4, %v2587_v35, 0.0 }
 0x17a   :  { %2031 = vtanh.f32 %v1113_v40  ;;  %1773 = vmatmul.msk.f32.gmra.mxu1 %vm312_vm3, %v2030_v45  ;;  %v2595_v40 = vadd.f32 %v2557_v21, %v2441_v16  ;;  %v2601_v45 = vadd.f32 %v2557_v21, %v2449_v24  ;;  %v533_v8 = vadd.f32 %v532_v39, %v531_v0 }
 0x17b   :  { %2033 = vtanh.f32 %v275_v47  ;;  %v544_v39 = vsel %vm526_vm4, %v2621_v31, 0.0  ;;  %v2633_v0 = vadd.f32 %v2557_v21, %v2489_v9 }
 0x17c   :  { %v2518_v49 = vpop.f32.mrf.mxu3  ;;  %v536_v47 = vsel %vm526_vm4, %v2595_v40, 0.0  ;;  %v538_v16 = vsel %vm526_vm4, %v2601_v45, 0.0 }
 0x17d   :  { %v548_v62 = vsel %vm526_vm4, %v2633_v0, 0.0 }
 0x17f   :  { %v1115_v50 = vpop.f32.mrf.mxu2  ;;  %v2521_v55 = vpop.f32.mrf.mxu1 }
 0x180   :  { %v2032_v53 = vpop.eup %2031  ;;  %v1116_v54 = vadd.f32 %v2208_v34, %v1115_v50  ;;  %v2607_v50 = vadd.f32 %v2557_v21, %v2457_v32 }
 0x181   :  { %1871 = vmatmul.msk.f32.gmra.mxu3 %vm312_vm3, %v2032_v53  ;;  %v2034_v58 = vpop.eup %2033  ;;  %v535_v53 = vadd.f32 %v534_v44, %v533_v8  ;;  %v2639_v8 = vadd.f32 %v2557_v21, %v2497_v19 }
 0x182   :  { %2035 = vtanh.f32 %v1116_v54  ;;  %1774 = vmatmul.msk.f32.gmra.mxu1 %vm312_vm3, %v2034_v58  ;;  %v2613_v54 = vadd.f32 %v2557_v21, %v2465_v42  ;;  %v540_v29 = vsel %vm526_vm4, %v2607_v50, 0.0 }
 0x183   :  { %v537_v58 = vadd.f32 %v536_v47, %v535_v53 }
 0x184   :  { %v2525_v59 = vpop.f32.mrf.mxu3  ;;  %v542_v48 = vsel %vm526_vm4, %v2613_v54, 0.0 }
 0x185   :  { %v539_v32 = vadd.f32 %v538_v16, %v537_v58  ;;  %v2645_v16 = vadd.f32 %v2557_v21, %v2505_v30 }
 0x187   :  { %v2527_v63 = vpop.f32.mrf.mxu1  ;;  %v541_v42 = vadd.f32 %v540_v29, %v539_v32  ;;  %v550_v29 = vsel %vm526_vm4, %v2639_v8, 0.0  ;;  %v2653_v32 = vadd.f32 %v2557_v21, %v2513_v43 }
 0x188   :  { %v2036_v61 = vpop.eup %2035 }
 0x189   :  { %1872 = vmatmul.msk.f32.gmra.mxu3 %vm312_vm3, %v2036_v61  ;;  %v543_v44 = vadd.f32 %v542_v48, %v541_v42  ;;  %v552_v48 = vsel %vm526_vm4, %v2645_v16, 0.0  ;;  %v2659_v42 = vadd.f32 %v2557_v21, %v2521_v55 }
 0x18b   :  { %v545_v47 = vadd.f32 %v544_v39, %v543_v44  ;;  %v554_v39 = vsel %vm526_vm4, %v2653_v32, 0.0  ;;  %v2665_v44 = vadd.f32 %v2557_v21, %v2527_v63  ;;  %v556_v43 = vsel %vm526_vm4, %v2659_v42, 0.0 }
 0x18c   :  { %v2530_v1 = vpop.f32.mrf.mxu3 }
 0x18d   :  { %v547_v58 = vadd.f32 %v546_v51, %v545_v47  ;;  %3980 = vst [vmem:[#allocation2_spill] sm:$0xff] %v2665_v44  ;;  %v558_v55 = vsel %vm526_vm4, %v2665_v44, 0.0 }
 0x18f   :  { %v2532_v2 = vpop.f32.mrf.mxu1  ;;  %v549_v19 = vadd.f32 %v548_v62, %v547_v58 }
 0x190   :  { %v2671_v62 = vadd.f32 %v2557_v21, %v2532_v2 }
 0x191   :  { %v551_v30 = vadd.f32 %v550_v29, %v549_v19 }
 0x192   :  { %3981 = vst [vmem:[#allocation3_spill] sm:$0xff] %v2671_v62 }
 0x193   :  { %v553_v51 = vadd.f32 %v552_v48, %v551_v30  ;;  %v560_v48 = vsel %vm526_vm4, %v2671_v62, 0.0 }
 0x194   :  { %v2534_v34 = vpop.f32.mrf.mxu3 }
 0x195   :  { %v555_v58 = vadd.f32 %v554_v39, %v553_v51 }
 0x197   :  { %v2536_v5 = vpop.f32.mrf.mxu1  ;;  %v557_v19 = vadd.f32 %v556_v43, %v555_v58 }
 0x198   :  { %v2677_v29 = vadd.f32 %v2557_v21, %v2536_v5 }
 0x199   :  { %v559_v2 = vadd.f32 %v558_v55, %v557_v19 }
 0x19a   :  { %v562_v39 = vsel %vm526_vm4, %v2677_v29, 0.0 }
 0x19b   :  { %v561_v5 = vadd.f32 %v560_v48, %v559_v2 }
 0x19c   :  { %v2538_v6 = vpop.f32.mrf.mxu3 }
 0x19d   :  { %v563_v62 = vadd.f32 %v562_v39, %v561_v5 }
 0x19f   :  { %v2540_v7 = vpop.f32.mrf.mxu1 }
 0x1a0   :  { %v2685_v30 = vadd.f32 %v2557_v21, %v2540_v7 }
 0x1a2   :  { %v564_v43 = vsel %vm526_vm4, %v2685_v30, 0.0 }
 0x1a3   :  { %v565_v19 = vadd.f32 %v564_v43, %v563_v62  ;;  %v2725_v62 = vadd.f32 %v2557_v21, %v2414_v52 }
 0x1a4   :  { %v2542_v10 = vpop.f32.mrf.mxu3 }
 0x1a5   :  { %3986 = vst [vmem:[#allocation8_spill] sm:$0xff] %v2725_v62 }
 0x1a7   :  { %v2544_v11 = vpop.f32.mrf.mxu1 }
 0x1a8   :  { %v2691_v51 = vadd.f32 %v2557_v21, %v2544_v11 }
 0x1aa   :  { %v566_v7 = vsel %vm526_vm4, %v2691_v51, 0.0 }
 0x1ab   :  { %v567_v2 = vadd.f32 %v566_v7, %v565_v19 }
 0x1ac   :  { %v2548_v15 = vpop.f32.mrf.mxu3 }
 0x1af   :  { %v2546_v13 = vpop.f32.mrf.mxu1 }
 0x1b0   :  { %v2697_v58 = vadd.f32 %v2557_v21, %v2546_v13  ;;  %v2713_v13 = vadd.f32 %v2557_v21, %v2422_v60 }
 0x1b2   :  { %v568_v11 = vsel %vm526_vm4, %v2697_v58, 0.0  ;;  %3984 = vst [vmem:[#allocation6_spill] sm:$0xff] %v2713_v13 }
 0x1b3   :  { %v569_v60 = vadd.f32 %v568_v11, %v567_v2  ;;  %v1359_v2 = vsel %vm526_vm4, %v2725_v62, 0.0  ;;  %v2764_v62 = vadd.f32 %v2557_v21, %v2454_v28 }
 0x1b4   :  { %v2552_v18 = vpop.f32.mrf.mxu3 }
 0x1b5   :  { %3989 = vst [vmem:[#allocation11_spill] sm:$0xff] %v2764_v62 }
 0x1b7   :  { %v2550_v17 = vpop.f32.mrf.mxu1 }
 0x1b8   :  { %v2703_v55 = vadd.f32 %v2557_v21, %v2550_v17 }
 0x1ba   :  { %3982 = vst [vmem:[#allocation4_spill] sm:$0xff] %v2703_v55  ;;  %v570_v5 = vsel %vm526_vm4, %v2703_v55, 0.0  ;;  %v2740_v55 = vadd.f32 %v2557_v21, %v2438_v12 }
 0x1bb   :  { %v571_v52 = vadd.f32 %v570_v5, %v569_v60 }
 0x1bc   :  { %v2581_v41 = vpop.f32.mrf.mxu3  ;;  %3988 = vst [vmem:[#allocation10_spill] sm:$0xff] %v2740_v55 }
 0x1bf   :  { %v2559_v22 = vpop.f32.mrf.mxu1 }
 0x1c0   :  { %v2709_v48 = vadd.f32 %v2557_v21, %v2559_v22  ;;  %v2729_v22 = vadd.f32 %v2557_v21, %v2430_v4 }
 0x1c2   :  { %3983 = vst [vmem:[#allocation5_spill] sm:$0xff] %v2709_v48  ;;  %v572_v7 = vsel %vm526_vm4, %v2709_v48, 0.0 }
 0x1c3   :  { %3987 = vst [vmem:[#allocation9_spill] sm:$0xff] %v2729_v22  ;;  %v573_v48 = vadd.f32 %v572_v7, %v571_v52 }
 0x1c4   :  { %v2615_v61 = vpop.f32.mrf.mxu3 }
 0x1c7   :  { %v2589_v38 = vpop.f32.mrf.mxu1 }
 0x1c8   :  { %v2721_v17 = vadd.f32 %v2557_v21, %v2589_v38  ;;  %v1360_v38 = vsel %vm526_vm4, %v2713_v13, 0.0  ;;  %v2753_v13 = vadd.f32 %v2557_v21, %v2446_v20 }
 0x1c9   :  { %v1361_v12 = vadd.f32 %v1360_v38, %v1359_v2 }
 0x1ca   :  { %3985 = vst [vmem:[#allocation7_spill] sm:$0xff] %v2721_v17  ;;  %v574_v4 = vsel %vm526_vm4, %v2721_v17, 0.0  ;;  %v1366_v38 = vsel %vm526_vm4, %v2753_v13, 0.0 }
 0x1cc   :  { %v2647_v9 = vpop.f32.mrf.mxu3 }
 0x1cf   :  { %v505_v24 = vpop.f32.mrf.mxu1 }
 0x1d0   :  { %v2734_v19 = vadd.f32 %v2557_v21, %v505_v24  ;;  %v1362_v24 = vsel %vm526_vm4, %v2729_v22, 0.0  ;;  %v575_v22 = vadd.f32 %v574_v4, %v573_v48 }
 0x1d1   :  { %v1363_v17 = vadd.f32 %v1362_v24, %v1361_v12  ;;  %v2788_v24 = vadd.f32 %v2557_v21, %v2470_v46 }
 0x1d2   :  { %v576_v5 = vsel %vm526_vm4, %v2734_v19, 0.0 }
 0x1d3   :  { %v577_v52 = vadd.f32 %v576_v5, %v575_v22  ;;  %3990 = vst [vmem:[#allocation12_spill] sm:$0xff] %v2788_v24 }
 0x1d4   :  { %v2679_v63 = vpop.f32.mrf.mxu3 }
 0x1d7   :  { %v508_v53 = vpop.f32.mrf.mxu1 }
 0x1d8   :  { %v2745_v11 = vadd.f32 %v2557_v21, %v508_v53  ;;  %v1364_v53 = vsel %vm526_vm4, %v2740_v55, 0.0 }
 0x1d9   :  { %v1365_v55 = vadd.f32 %v1364_v53, %v1363_v17 }
 0x1da   :  { %v578_v20 = vsel %vm526_vm4, %v2745_v11, 0.0 }
 0x1db   :  { %v1367_v12 = vadd.f32 %v1366_v38, %v1365_v55  ;;  %v1372_v55 = vsel %vm526_vm4, %v2788_v24, 0.0 }
 0x1dc   :  { %v2715_v39 = vpop.f32.mrf.mxu3 }
 0x1df   :  { %v511_v47 = vpop.f32.mrf.mxu1 }
 0x1e0   :  { %v2758_v60 = vadd.f32 %v2557_v21, %v511_v47  ;;  %v2775_v47 = vadd.f32 %v2557_v21, %v2462_v37  ;;  %v579_v37 = vadd.f32 %v578_v20, %v577_v52  ;;  %v2807_v20 = vadd.f32 %v2557_v21, %v2486_v3 }
 0x1e2   :  { %v580_v48 = vsel %vm526_vm4, %v2758_v60, 0.0  ;;  %v1370_v5 = vsel %vm526_vm4, %v2775_v47, 0.0  ;;  %v1376_v3 = vsel %vm526_vm4, %v2807_v20, 0.0 }
 0x1e3   :  { %v581_v53 = vadd.f32 %v580_v48, %v579_v37  ;;  %v2815_v48 = vadd.f32 %v2557_v21, %v2494_v14 }
 0x1e4   :  { %v2777_v2 = vpop.f32.mrf.mxu3 }
 0x1e5   :  { %3991 = vst [vmem:[#allocation13_spill] sm:$0xff] %v2815_v48 }
 0x1e7   :  { %v514_v44 = vpop.f32.mrf.mxu1 }
 0x1e8   :  { %v2769_v7 = vadd.f32 %v2557_v21, %v514_v44  ;;  %v1368_v44 = vsel %vm526_vm4, %v2764_v62, 0.0 }
 0x1e9   :  { %v1369_v62 = vadd.f32 %v1368_v44, %v1367_v12 }
 0x1ea   :  { %v582_v22 = vsel %vm526_vm4, %v2769_v7, 0.0 }
 0x1eb   :  { %v583_v38 = vadd.f32 %v582_v22, %v581_v53  ;;  %v1371_v52 = vadd.f32 %v1370_v5, %v1369_v62  ;;  %v2824_v62 = vadd.f32 %v2557_v21, %v2502_v25 }
 0x1ec   :  { %v2826_v22 = vpop.f32.mrf.mxu3 }
 0x1ed   :  { %v1373_v12 = vadd.f32 %v1372_v55, %v1371_v52  ;;  %v2834_v55 = vadd.f32 %v2557_v21, %v2510_v36  ;;  %v1380_v25 = vsel %vm526_vm4, %v2824_v62, 0.0 }
 0x1ef   :  { %v517_v43 = vpop.f32.mrf.mxu1 }
 0x1f0   :  { %v2782_v4 = vadd.f32 %v2557_v21, %v517_v43  ;;  %v2799_v43 = vadd.f32 %v2557_v21, %v2478_v57 }
 0x1f2   :  { %v584_v46 = vsel %vm526_vm4, %v2782_v4, 0.0  ;;  %v1374_v57 = vsel %vm526_vm4, %v2799_v43, 0.0 }
 0x1f3   :  { %v585_v44 = vadd.f32 %v584_v46, %v583_v38  ;;  %v1375_v53 = vadd.f32 %v1374_v57, %v1373_v12  ;;  %v1378_v46 = vsel %vm526_vm4, %v2815_v48, 0.0  ;;  %v2846_v12 = vadd.f32 %v2557_v21, %v2525_v59 }
 0x1f4   :  { %v1347_v59 = vpop.f32.mrf.mxu3 }
 0x1f5   :  { %v1377_v52 = vadd.f32 %v1376_v3, %v1375_v53 }
 0x1f7   :  { %v520_v28 = vpop.f32.mrf.mxu1  ;;  %v1379_v57 = vadd.f32 %v1378_v46, %v1377_v52  ;;  %v2858_v46 = vadd.f32 %v2557_v21, %v2534_v34 }
 0x1f8   :  { %v2793_v17 = vadd.f32 %v2557_v21, %v520_v28 }
 0x1f9   :  { %v1381_v48 = vadd.f32 %v1380_v25, %v1379_v57  ;;  %v2870_v57 = vadd.f32 %v2557_v21, %v2542_v10 }
 0x1fa   :  { %v586_v28 = vsel %vm526_vm4, %v2793_v17, 0.0 }
 0x1fb   :  { %v587_v5 = vadd.f32 %v586_v28, %v585_v44  ;;  %v1382_v44 = vsel %vm526_vm4, %v2834_v55, 0.0 }
 0x1fc   :  { %v1383_v53 = vadd.f32 %v1382_v44, %v1381_v48  ;;  %v1390_v48 = vsel %vm526_vm4, %v2858_v46, 0.0 }
 0x1ff   :  { %v523_v37 = vpop.f32.mrf.mxu1 }
 0x200   :  { %v2818_v24 = vadd.f32 %v2557_v21, %v523_v37  ;;  %v2840_v37 = vadd.f32 %v2557_v21, %v2518_v49 }
 0x202   :  { %v588_v14 = vsel %vm526_vm4, %v2818_v24, 0.0  ;;  %v1384_v3 = vsel %vm526_vm4, %v2840_v37, 0.0 }
 0x203   :  { %v589_v38 = vadd.f32 %v588_v14, %v587_v5  ;;  %v2852_v5 = vadd.f32 %v2557_v21, %v2530_v1  ;;  %v1386_v14 = vsel %vm526_vm4, %v2846_v12, 0.0 }
 0x205   :  { %v590_v28 = vrot.slane %v589_v38, 4  ;;  %v1388_v25 = vsel %vm526_vm4, %v2852_v5, 0.0 }
 0x207   :  { %v591_v36 = vadd.f32 %v590_v28, %v589_v38  ;;  %v1385_v38 = vadd.f32 %v1384_v3, %v1383_v53  ;;  %v2864_v28 = vadd.f32 %v2557_v21, %v2538_v6  ;;  %v2876_v3 = vadd.f32 %v2557_v21, %v2548_v15 }
 0x208   :  { %v1394_v6 = vsel %vm526_vm4, %v2870_v57, 0.0  ;;  %v2882_v53 = vadd.f32 %v2557_v21, %v2552_v18 }
 0x209   :  { %v592_v49 = vrot.slane %v591_v36, 2  ;;  %v1387_v1 = vadd.f32 %v1386_v14, %v1385_v38  ;;  %v1396_v38 = vsel %vm526_vm4, %v2876_v3, 0.0 }
 0x20b   :  { %v593_v52 = vadd.f32 %v592_v49, %v591_v36  ;;  %v1389_v44 = vadd.f32 %v1388_v25, %v1387_v1  ;;  %v1392_v36 = vsel %vm526_vm4, %v2864_v28, 0.0  ;;  %v2888_v25 = vadd.f32 %v2557_v21, %v2581_v41  ;;  %v1350_v1 = vpop.f32.mrf.mxu3 }
 0x20d   :  { %v594_v34 = vrot.slane %v593_v52, 1  ;;  %v1391_v49 = vadd.f32 %v1390_v48, %v1389_v44  ;;  %v1398_v48 = vsel %vm526_vm4, %v2882_v53, 0.0  ;;  %v2894_v44 = vadd.f32 %v2557_v21, %v2615_v61 }
 0x20f   :  { %v595_v14 = vadd.f32 %v594_v34, %v593_v52  ;;  %v1393_v10 = vadd.f32 %v1392_v36, %v1391_v49  ;;  %v1400_v34 = vsel %vm526_vm4, %v2888_v25, 0.0  ;;  %v2902_v36 = vadd.f32 %v2557_v21, %v2647_v9 }
 0x210   :  { %v1402_v49 = vsel %vm526_vm4, %v2894_v44, 0.0 }
 0x211   :  { %v1395_v15 = vadd.f32 %v1394_v6, %v1393_v10  ;;  %v2896_v18 = vmul.f32 0.00390625, %v595_v14  ;;  %v2908_v6 = vadd.f32 %v2557_v21, %v2679_v63  ;;  %v1404_v9 = vsel %vm526_vm4, %v2902_v36, 0.0 }
 0x212   :  { %v2926_v63 = vadd.f32 %v2557_v21, %v2715_v39 }
 0x213   :  { %v1397_v52 = vadd.f32 %v1396_v38, %v1395_v15  ;;  %v2912_v61 = vsub.f32 %v2563_v23, %v2896_v18  ;;  %v2916_v14 = vsub.f32 %v2567_v26, %v2896_v18  ;;  %v2922_v38 = vsub.f32 %v2571_v27, %v2896_v18  ;;  %v1353_v27 = vpop.f32.mrf.mxu3 }
 0x214   :  { %v1406_v23 = vsel %vm526_vm4, %v2908_v6, 0.0  ;;  %v2932_v26 = vsub.f32 %v2579_v33, %v2896_v18  ;;  %v2944_v39 = vsub.f32 %v2587_v35, %v2896_v18 }
 0x215   :  { %v1399_v41 = vadd.f32 %v1398_v48, %v1397_v52  ;;  %3992 = vst [vmem:[#allocation14_spill] sm:$0xff] %v2912_v61  ;;  %v629_v48 = vmul.f32 %v2912_v61, %v2912_v61  ;;  %v630_v52 = vmul.f32 %v2916_v14, %v2916_v14  ;;  %v631_v33 = vmul.f32 %v2922_v38, %v2922_v38 }
 0x216   :  { %3993 = vst [vmem:[#allocation15_spill] sm:$0xff] %v2916_v14  ;;  %v2952_v14 = vadd.f32 %v2557_v21, %v2826_v22  ;;  %v2969_v61 = vsub.f32 %v2601_v45, %v2896_v18 }
 0x217   :  { %v1401_v10 = vadd.f32 %v1400_v34, %v1399_v41  ;;  %3994 = vst [vmem:[#allocation16_spill] sm:$0xff] %v2922_v38  ;;  %v2940_v41 = vadd.f32 %v2557_v21, %v2777_v2  ;;  %v632_v2 = vmul.f32 %v2932_v26, %v2932_v26  ;;  %v661_v35 = vsel %vm526_vm4, %v629_v48, 0.0 }
 0x218   :  { %3995 = vst [vmem:[#allocation17_spill] sm:$0xff] %v2932_v26  ;;  %v664_v26 = vsel %vm526_vm4, %v631_v33, 0.0  ;;  %v1412_v48 = vsel %vm526_vm4, %v2952_v14, 0.0 }
 0x219   :  { %v1403_v15 = vadd.f32 %v1402_v49, %v1401_v10  ;;  %3996 = vst [vmem:[#allocation18_spill] sm:$0xff] %v2940_v41  ;;  %v1408_v10 = vsel %vm526_vm4, %v2926_v63, 0.0 }
 0x21b   :  { %v1405_v34 = vadd.f32 %v1404_v9, %v1403_v15  ;;  %v2956_v9 = vsub.f32 %v2595_v40, %v2896_v18  ;;  %v662_v15 = vsel %vm526_vm4, %v630_v52, 0.0  ;;  %v633_v40 = vmul.f32 %v2944_v39, %v2944_v39 }
 0x21c   :  { %v663_v38 = vadd.f32 %v662_v15, %v661_v35  ;;  %v2977_v52 = vadd.f32 %v2557_v21, %v1350_v1  ;;  %v2990_v1 = vsub.f32 %v2613_v54, %v2896_v18 }
 0x21d   :  { %v1407_v49 = vadd.f32 %v1406_v23, %v1405_v34  ;;  %3997 = vst [vmem:[#allocation19_spill] sm:$0xff] %v2956_v9  ;;  %v1410_v23 = vsel %vm526_vm4, %v2940_v41, 0.0  ;;  %v2965_v34 = vadd.f32 %v2557_v21, %v1347_v59  ;;  %v634_v45 = vmul.f32 %v2956_v9, %v2956_v9 }
 0x21e   :  { %v665_v41 = vadd.f32 %v664_v26, %v663_v38  ;;  %v635_v38 = vmul.f32 %v2969_v61, %v2969_v61  ;;  %v1356_v26 = vpop.f32.mrf.mxu3  ;;  %v2999_v9 = vsub.f32 %v2621_v31, %v2896_v18  ;;  %v637_v31 = vmul.f32 %v2990_v1, %v2990_v1 }
 0x21f   :  { %v1409_v22 = vadd.f32 %v1408_v10, %v1407_v49  ;;  %v2981_v49 = vsub.f32 %v2607_v50, %v2896_v18  ;;  %v666_v10 = vsel %vm526_vm4, %v632_v2, 0.0  ;;  %v1414_v33 = vsel %vm526_vm4, %v2965_v34, 0.0 }
 0x220   :  { %v667_v35 = vadd.f32 %v666_v10, %v665_v41  ;;  %v668_v50 = vsel %vm526_vm4, %v633_v40, 0.0  ;;  %v670_v54 = vsel %vm526_vm4, %v634_v45, 0.0  ;;  %v3008_v40 = vadd.f32 %v2557_v21, %v1356_v26 }
 0x221   :  { %v1411_v59 = vadd.f32 %v1410_v23, %v1409_v22  ;;  %v1416_v23 = vsel %vm526_vm4, %v2977_v52, 0.0  ;;  %v636_v41 = vmul.f32 %v2981_v49, %v2981_v49 }
 0x222   :  { %v669_v22 = vadd.f32 %v668_v50, %v667_v35  ;;  %v672_v35 = vsel %vm526_vm4, %v635_v38, 0.0  ;;  %v3030_v38 = vsub.f32 %v2639_v8, %v2896_v18  ;;  %v3044_v8 = vsub.f32 %v2653_v32, %v2896_v18  ;;  %v3998_v32 = vld [vmem:[#allocation2_spill] sm:$0xff] }
 0x223   :  { %v1413_v15 = vadd.f32 %v1412_v48, %v1411_v59  ;;  %v3005_v59 = vadd.f32 %v2557_v21, %v1353_v27  ;;  %v1420_v27 = vsel %vm526_vm4, %v3008_v40, 0.0  ;;  %v3023_v21 = vsub.f32 %v2633_v0, %v2896_v18 }
 0x224   :  { %v671_v48 = vadd.f32 %v670_v54, %v669_v22  ;;  %v674_v50 = vsel %vm526_vm4, %v636_v41, 0.0  ;;  %v3037_v0 = vsub.f32 %v2645_v16, %v2896_v18  ;;  %v3051_v16 = vsub.f32 %v2659_v42, %v2896_v18  ;;  %v3999_v42 = vld [vmem:[#allocation3_spill] sm:$0xff] }
 0x225   :  { %v1415_v2 = vadd.f32 %v1414_v33, %v1413_v15  ;;  %v3012_v33 = vsub.f32 %v2627_v56, %v2896_v18  ;;  %v1418_v45 = vsel %vm526_vm4, %v3005_v59, 0.0  ;;  %v638_v56 = vmul.f32 %v2999_v9, %v2999_v9 }
 0x226   :  { %v673_v15 = vadd.f32 %v672_v35, %v671_v48  ;;  %v640_v41 = vmul.f32 %v3023_v21, %v3023_v21 }
 0x227   :  { %v1417_v10 = vadd.f32 %v1416_v23, %v1415_v2  ;;  %v639_v22 = vmul.f32 %v3012_v33, %v3012_v33  ;;  %v676_v2 = vsel %vm526_vm4, %v637_v31, 0.0  ;;  %v641_v31 = vmul.f32 %v3030_v38, %v3030_v38 }
 0x228   :  { %v675_v23 = vadd.f32 %v674_v50, %v673_v15 }
 0x229   :  { %v1419_v26 = vadd.f32 %v1418_v45, %v1417_v10  ;;  %v678_v10 = vsel %vm526_vm4, %v638_v56, 0.0  ;;  %v680_v45 = vsel %vm526_vm4, %v639_v22, 0.0  ;;  %v642_v56 = vmul.f32 %v3037_v0, %v3037_v0 }
 0x22a   :  { %v677_v48 = vadd.f32 %v676_v2, %v675_v23  ;;  %v643_v22 = vmul.f32 %v3044_v8, %v3044_v8 }
 0x22b   :  { %v1421_v54 = vadd.f32 %v1420_v27, %v1419_v26  ;;  %v682_v26 = vsel %vm526_vm4, %v640_v41, 0.0  ;;  %v686_v41 = vsel %vm526_vm4, %v642_v56, 0.0 }
 0x22c   :  { %v679_v15 = vadd.f32 %v678_v10, %v677_v48  ;;  %v3058_v48 = vsub.f32 %v3998_v32, %v2896_v18 }
 0x22d   :  { %v1422_v35 = vrot.slane %v1421_v54, 4 }
 0x22e   :  { %v681_v50 = vadd.f32 %v680_v45, %v679_v15  ;;  %v644_v15 = vmul.f32 %v3051_v16, %v3051_v16  ;;  %v645_v32 = vmul.f32 %v3058_v48, %v3058_v48 }
 0x22f   :  { %v1423_v27 = vadd.f32 %v1422_v35, %v1421_v54  ;;  %v684_v54 = vsel %vm526_vm4, %v641_v31, 0.0  ;;  %v3065_v35 = vsub.f32 %v3999_v42, %v2896_v18  ;;  %v688_v31 = vsel %vm526_vm4, %v643_v22, 0.0 }
 0x230   :  { %v683_v2 = vadd.f32 %v682_v26, %v681_v50  ;;  %v3072_v26 = vsub.f32 %v2677_v29, %v2896_v18  ;;  %v3086_v29 = vsub.f32 %v2691_v51, %v2896_v18  ;;  %v692_v22 = vsel %vm526_vm4, %v645_v32, 0.0  ;;  %v4002_v51 = vld [vmem:[#allocation4_spill] sm:$0xff] }
 0x231   :  { %v1424_v23 = vrot.slane %v1423_v27, 2  ;;  %v646_v42 = vmul.f32 %v3065_v35, %v3065_v35 }
 0x232   :  { %v685_v10 = vadd.f32 %v684_v54, %v683_v2  ;;  %4000 = vst [vmem:[#allocation2_spill] sm:$0xff] %v3072_v26  ;;  %v3079_v54 = vsub.f32 %v2685_v30, %v2896_v18  ;;  %v3093_v30 = vsub.f32 %v2697_v58, %v2896_v18  ;;  %v4004_v58 = vld [vmem:[#allocation5_spill] sm:$0xff] }
 0x233   :  { %v1425_v45 = vadd.f32 %v1424_v23, %v1423_v27  ;;  %v690_v27 = vsel %vm526_vm4, %v644_v15, 0.0  ;;  %v694_v15 = vsel %vm526_vm4, %v646_v42, 0.0 }
 0x234   :  { %v687_v50 = vadd.f32 %v686_v41, %v685_v10  ;;  %4001 = vst [vmem:[#allocation3_spill] sm:$0xff] %v3079_v54  ;;  %v647_v10 = vmul.f32 %v3072_v26, %v3072_v26  ;;  %v649_v26 = vmul.f32 %v3086_v29, %v3086_v29 }
 0x235   :  { %v1426_v56 = vrot.slane %v1425_v45, 1 }
 0x236   :  { %v689_v2 = vadd.f32 %v688_v31, %v687_v50  ;;  %v648_v50 = vmul.f32 %v3079_v54, %v3079_v54  ;;  %v696_v32 = vsel %vm526_vm4, %v647_v10, 0.0  ;;  %v650_v54 = vmul.f32 %v3093_v30, %v3093_v30 }
 0x237   :  { %v1427_v31 = vadd.f32 %v1426_v56, %v1425_v45 }
 0x238   :  { %v691_v23 = vadd.f32 %v690_v27, %v689_v2  ;;  %v3100_v27 = vsub.f32 %v4002_v51, %v2896_v18  ;;  %v698_v45 = vsel %vm526_vm4, %v648_v50, 0.0  ;;  %v3123_v51 = vsub.f32 %v2734_v19, %v2896_v18 }
 0x239   :  { %v3112_v42 = vmul.f32 0.00390625, %v1427_v31  ;;  %v702_v31 = vsel %vm526_vm4, %v650_v54, 0.0  ;;  %v4013_v54 = vld [vmem:[#allocation9_spill] sm:$0xff] }
 0x23a   :  { %v693_v41 = vadd.f32 %v692_v22, %v691_v23  ;;  %4003 = vst [vmem:[#allocation4_spill] sm:$0xff] %v3100_v27  ;;  %v3107_v22 = vsub.f32 %v4004_v58, %v2896_v18  ;;  %v651_v10 = vmul.f32 %v3100_v27, %v3100_v27 }
 0x23c   :  { %v695_v2 = vadd.f32 %v694_v15, %v693_v41  ;;  %4005 = vst [vmem:[#allocation5_spill] sm:$0xff] %v3107_v22  ;;  %v4006_v41 = vld [vmem:[#allocation7_spill] sm:$0xff]  ;;  %v652_v50 = vmul.f32 %v3107_v22, %v3107_v22 }
 0x23d   :  { %v3116_v15 = vsub.f32 %v4006_v41, %v2896_v18 }
 0x23e   :  { %v697_v23 = vadd.f32 %v696_v32, %v695_v2  ;;  %v700_v2 = vsel %vm526_vm4, %v649_v26, 0.0  ;;  %v3138_v26 = vsub.f32 %v2745_v11, %v2896_v18  ;;  %v706_v11 = vsel %vm526_vm4, %v652_v50, 0.0 }
 0x23f   :  { %4007 = vst [vmem:[#allocation7_spill] sm:$0xff] %v3116_v15  ;;  %v653_v19 = vmul.f32 %v3116_v15, %v3116_v15 }
 0x240   :  { %v699_v56 = vadd.f32 %v698_v45, %v697_v23  ;;  %v4008_v23 = vld [vmem:[#allocation8_spill] sm:$0xff]  ;;  %v4010_v45 = vld [vmem:[#allocation6_spill] sm:$0xff]  ;;  %4012 = vst [vmem:[#allocation20_spill] sm:$0xff] %v3138_v26 }
 0x241   :  { %v3130_v58 = vsub.f32 %v4008_v23, %v3112_v42  ;;  %v3134_v41 = vsub.f32 %v4010_v45, %v3112_v42  ;;  %v3149_v23 = vsub.f32 %v2758_v60, %v2896_v18  ;;  %v4016_v45 = vld [vmem:[#allocation10_spill] sm:$0xff]  ;;  %v3164_v60 = vsub.f32 %v2769_v7, %v2896_v18 }
 0x242   :  { %v701_v32 = vadd.f32 %v700_v2, %v699_v56  ;;  %v704_v56 = vsel %vm526_vm4, %v651_v10, 0.0  ;;  %v3145_v2 = vsub.f32 %v4013_v54, %v3112_v42  ;;  %v3156_v22 = vsub.f32 %v4016_v45, %v3112_v42 }
 0x243   :  { %4009 = vst [vmem:[#allocation8_spill] sm:$0xff] %v3130_v58  ;;  %v1461_v10 = vmul.f32 %v3130_v58, %v3130_v58  ;;  %v1462_v54 = vmul.f32 %v3134_v41, %v3134_v41  ;;  %v708_v50 = vsel %vm526_vm4, %v653_v19, 0.0  ;;  %v656_v7 = vmul.f32 %v3149_v23, %v3149_v23  ;;  %v4020_v58 = vld [vmem:[#allocation11_spill] sm:$0xff] }
 0x244   :  { %4011 = vst [vmem:[#allocation6_spill] sm:$0xff] %v3134_v41  ;;  %v703_v27 = vadd.f32 %v702_v31, %v701_v32  ;;  %v654_v32 = vmul.f32 %v3123_v51, %v3123_v51  ;;  %v1463_v45 = vmul.f32 %v3145_v2, %v3145_v2  ;;  %v3177_v41 = vsub.f32 %v2782_v4, %v2896_v18 }
 0x245   :  { %4014 = vst [vmem:[#allocation9_spill] sm:$0xff] %v3145_v2  ;;  %v3184_v19 = vsub.f32 %v4020_v58, %v3112_v42  ;;  %v1494_v2 = vsel %vm526_vm4, %v1462_v54, 0.0  ;;  %v3192_v4 = vsub.f32 %v2793_v17, %v2896_v18  ;;  %v3199_v58 = vsub.f32 %v2775_v47, %v3112_v42 }
 0x246   :  { %4015 = vst [vmem:[#allocation21_spill] sm:$0xff] %v3149_v23  ;;  %v705_v31 = vadd.f32 %v704_v56, %v703_v27  ;;  %v655_v27 = vmul.f32 %v3138_v26, %v3138_v26  ;;  %v3171_v56 = vsub.f32 %v2753_v13, %v3112_v42  ;;  %v1464_v13 = vmul.f32 %v3156_v22, %v3156_v22 }
 0x247   :  { %4017 = vst [vmem:[#allocation10_spill] sm:$0xff] %v3156_v22  ;;  %v1493_v26 = vsel %vm526_vm4, %v1461_v10, 0.0  ;;  %v1496_v54 = vsel %vm526_vm4, %v1463_v45, 0.0  ;;  %v3206_v17 = vsub.f32 %v2818_v24, %v2896_v18  ;;  %v658_v22 = vmul.f32 %v3177_v41, %v3177_v41 }
 0x248   :  { %v707_v15 = vadd.f32 %v706_v11, %v705_v31  ;;  %4018 = vst [vmem:[#allocation22_spill] sm:$0xff] %v3171_v56  ;;  %v710_v11 = vsel %vm526_vm4, %v654_v32, 0.0  ;;  %v1495_v32 = vadd.f32 %v1494_v2, %v1493_v26  ;;  %v712_v23 = vsel %vm526_vm4, %v655_v27, 0.0  ;;  %v4022_v27 = vld [vmem:[#allocation12_spill] sm:$0xff] }
 0x249   :  { %4019 = vst [vmem:[#allocation23_spill] sm:$0xff] %v3177_v41  ;;  %v1465_v10 = vmul.f32 %v3171_v56, %v3171_v56  ;;  %v714_v2 = vsel %vm526_vm4, %v656_v7, 0.0  ;;  %v3213_v47 = vsub.f32 %v4022_v27, %v3112_v42  ;;  %v1498_v45 = vsel %vm526_vm4, %v1464_v13, 0.0 }
 0x24a   :  { %v709_v31 = vadd.f32 %v708_v50, %v707_v15  ;;  %v657_v15 = vmul.f32 %v3164_v60, %v3164_v60  ;;  %4021 = vst [vmem:[#allocation11_spill] sm:$0xff] %v3199_v58  ;;  %v1497_v26 = vadd.f32 %v1496_v54, %v1495_v32  ;;  %v659_v24 = vmul.f32 %v3192_v4, %v3192_v4 }
 0x24b   :  { %v1467_v7 = vmul.f32 %v3199_v58, %v3199_v58  ;;  %v660_v32 = vmul.f32 %v3206_v17, %v3206_v17  ;;  %v718_v27 = vsel %vm526_vm4, %v658_v22, 0.0 }
 0x24c   :  { %v711_v50 = vadd.f32 %v710_v11, %v709_v31  ;;  %v1466_v11 = vmul.f32 %v3184_v19, %v3184_v19  ;;  %v1499_v56 = vadd.f32 %v1498_v45, %v1497_v26  ;;  %v716_v41 = vsel %vm526_vm4, %v657_v15, 0.0  ;;  %v4023_v45 = vld [vmem:[#allocation13_spill] sm:$0xff] }
 0x24d   :  { %v3241_v58 = vsub.f32 %v4023_v45, %v3112_v42 }
 0x24e   :  { %v713_v31 = vadd.f32 %v712_v23, %v711_v50  ;;  %v3223_v23 = vsub.f32 %v2799_v43, %v3112_v42  ;;  %v1500_v50 = vsel %vm526_vm4, %v1465_v10, 0.0  ;;  %v1468_v43 = vmul.f32 %v3213_v47, %v3213_v47 }
 0x24f   :  { %v1501_v54 = vadd.f32 %v1500_v50, %v1499_v56  ;;  %v1502_v15 = vsel %vm526_vm4, %v1466_v11, 0.0  ;;  %v720_v10 = vsel %vm526_vm4, %v659_v24, 0.0  ;;  %v3249_v11 = vsub.f32 %v2824_v62, %v3112_v42 }
 0x250   :  { %v715_v18 = vadd.f32 %v714_v2, %v713_v31  ;;  %v3233_v31 = vsub.f32 %v2807_v20, %v3112_v42  ;;  %v1469_v22 = vmul.f32 %v3223_v23, %v3223_v23  ;;  %v1506_v50 = vsel %vm526_vm4, %v1468_v43, 0.0 }
 0x251   :  { %v1503_v2 = vadd.f32 %v1502_v15, %v1501_v54  ;;  %v3263_v62 = vsub.f32 %v2840_v37, %v3112_v42  ;;  %v1472_v43 = vmul.f32 %v3249_v11, %v3249_v11 }
 0x252   :  { %v717_v13 = vadd.f32 %v716_v41, %v715_v18  ;;  %v1504_v41 = vsel %vm526_vm4, %v1467_v7, 0.0  ;;  %v722_v18 = vsel %vm526_vm4, %v660_v32, 0.0  ;;  %v1470_v24 = vmul.f32 %v3233_v31, %v3233_v31 }
 0x253   :  { %v1505_v56 = vadd.f32 %v1504_v41, %v1503_v2  ;;  %v1471_v7 = vmul.f32 %v3241_v58, %v3241_v58  ;;  %v1508_v32 = vsel %vm526_vm4, %v1469_v22, 0.0  ;;  %v3273_v22 = vsub.f32 %v2846_v12, %v3112_v42 }
 0x254   :  { %v719_v26 = vadd.f32 %v718_v27, %v717_v13  ;;  %v3256_v27 = vsub.f32 %v2834_v55, %v3112_v42  ;;  %v1510_v2 = vsel %vm526_vm4, %v1470_v24, 0.0  ;;  %v1474_v37 = vmul.f32 %v3263_v62, %v3263_v62 }
 0x255   :  { %v1507_v54 = vadd.f32 %v1506_v50, %v1505_v56  ;;  %v1512_v41 = vsel %vm526_vm4, %v1471_v7, 0.0  ;;  %v1475_v7 = vmul.f32 %v3273_v22, %v3273_v22 }
 0x256   :  { %v721_v20 = vadd.f32 %v720_v10, %v719_v26  ;;  %v1473_v55 = vmul.f32 %v3256_v27, %v3256_v27 }
 0x257   :  { %v1509_v26 = vadd.f32 %v1508_v32, %v1507_v54  ;;  %v3281_v32 = vsub.f32 %v2852_v5, %v3112_v42 }
 0x258   :  { %v723_v13 = vadd.f32 %v722_v18, %v721_v20  ;;  %v1514_v18 = vsel %vm526_vm4, %v1472_v43, 0.0  ;;  %v3288_v43 = vsub.f32 %v2858_v46, %v3112_v42  ;;  %v3302_v46 = vsub.f32 %v2870_v57, %v3112_v42 }
 0x259   :  { %v1511_v45 = vadd.f32 %v1510_v2, %v1509_v26 }
 0x25a   :  { %v724_v15 = vrot.slane %v723_v13, 4 }
 0x25b   :  { %v1513_v56 = vadd.f32 %v1512_v41, %v1511_v45 }
 0x25c   :  { %v725_v10 = vadd.f32 %v724_v15, %v723_v13  ;;  %v1516_v13 = vsel %vm526_vm4, %v1473_v55, 0.0  ;;  %v1518_v15 = vsel %vm526_vm4, %v1474_v37, 0.0  ;;  %v1520_v55 = vsel %vm526_vm4, %v1475_v7, 0.0 }
 0x25d   :  { %v1515_v24 = vadd.f32 %v1514_v18, %v1513_v56  ;;  %v1477_v56 = vmul.f32 %v3288_v43, %v3288_v43 }
 0x25e   :  { %v726_v20 = vrot.slane %v725_v10, 2 }
 0x25f   :  { %v1517_v12 = vadd.f32 %v1516_v13, %v1515_v24  ;;  %v1524_v24 = vsel %vm526_vm4, %v1477_v56, 0.0  ;;  %v3323_v56 = vsub.f32 %v2888_v25, %v3112_v42 }
 0x260   :  { %v727_v50 = vadd.f32 %v726_v20, %v725_v10  ;;  %v1476_v10 = vmul.f32 %v3281_v32, %v3281_v32  ;;  %v3295_v20 = vsub.f32 %v2864_v28, %v3112_v42  ;;  %v3309_v28 = vsub.f32 %v2876_v3, %v3112_v42 }
 0x261   :  { %v1519_v2 = vadd.f32 %v1518_v15, %v1517_v12  ;;  %v1479_v12 = vmul.f32 %v3302_v46, %v3302_v46 }
 0x262   :  { %v728_v54 = vrot.slane %v727_v50, 1  ;;  %v1522_v37 = vsel %vm526_vm4, %v1476_v10, 0.0  ;;  %v1480_v10 = vmul.f32 %v3309_v28, %v3309_v28 }
 0x263   :  { %v1521_v5 = vadd.f32 %v1520_v55, %v1519_v2  ;;  %v1528_v55 = vsel %vm526_vm4, %v1479_v12, 0.0 }
 0x264   :  { %v729_v26 = vadd.f32 %v728_v54, %v727_v50  ;;  %v1478_v50 = vmul.f32 %v3295_v20, %v3295_v20 }
 0x265   :  { %v1523_v18 = vadd.f32 %v1522_v37, %v1521_v5 }
 0x266   :  { %v730_v45 = vmul.f32 0.00390625, %v729_v26  ;;  %v1526_v15 = vsel %vm526_vm4, %v1478_v50, 0.0 }
 0x267   :  { %v1525_v13 = vadd.f32 %v1524_v24, %v1523_v18  ;;  %v1530_v18 = vsel %vm526_vm4, %v1480_v10, 0.0 }
 0x268   :  { %v731_v41 = vadd.f32 1e-05, %v730_v45  ;;  %v3316_v45 = vsub.f32 %v2882_v53, %v3112_v42  ;;  %v3330_v53 = vsub.f32 %v2894_v44, %v3112_v42 }
 0x269   :  { %v1527_v57 = vadd.f32 %v1526_v15, %v1525_v13  ;;  %v1482_v13 = vmul.f32 %v3323_v56, %v3323_v56  ;;  %v3339_v15 = vsub.f32 %v2902_v36, %v3112_v42  ;;  %v4027_v36 = vld [vmem:[#allocation14_spill] sm:$0xff] }
 0x26a   :  { %2037 = vrsqrt.f32 %v731_v41  ;;  %v1481_v37 = vmul.f32 %v3316_v45, %v3316_v45  ;;  %vm738_vm6 = vweird.f32 %v731_v41 }
 0x26b   :  { %v1529_v5 = vadd.f32 %v1528_v55, %v1527_v57  ;;  %4024 = vst [vmem:[#allocation12_spill] sm:$0xff] %v3339_v15  ;;  %v1534_v44 = vsel %vm526_vm4, %v1482_v13, 0.0  ;;  %v3346_v57 = vsub.f32 %v2908_v6, %v3112_v42  ;;  %v4028_v55 = vld [vmem:[#allocation15_spill] sm:$0xff]  ;;  %v3375_v13 = vsub.f32 %v2965_v34, %v3112_v42 }
 0x26d   :  { %v1531_v50 = vadd.f32 %v1530_v18, %v1529_v5  ;;  %4025 = vst [vmem:[#allocation13_spill] sm:$0xff] %v3346_v57 }
 0x270   :  { %v2038_v54 = vpop.eup %2037 }
 0x271   :  { %v733_v7 = vmul.f32 %v2038_v54, %v731_v41  ;;  %vm739_vm5 = vweird.f32 %v2038_v54  ;;  %v3350_v41 = vsub.f32 %v2926_v63, %v3112_v42  ;;  %v4032_v63 = vld [vmem:[#allocation17_spill] sm:$0xff] }
 0x272   :  { %vm740_vm7 = vmor %vm738_vm6, %vm739_vm5 }
 0x273   :  { %v734_v26 = vmul.f32 %v2038_v54, %v733_v7  ;;  %v1532_v7 = vsel %vm526_vm4, %v1481_v37, 0.0  ;;  %4026 = vst [vmem:[#allocation24_spill] sm:$0xff] %v3350_v41  ;;  %v4030_v37 = vld [vmem:[#allocation18_spill] sm:$0xff] }
 0x274   :  { %v1533_v25 = vadd.f32 %v1532_v7, %v1531_v50  ;;  %v3365_v18 = vsub.f32 %v4030_v37, %v3112_v42  ;;  %v3379_v7 = vsub.f32 %v2977_v52, %v3112_v42  ;;  %v1485_v52 = vmul.f32 %v3346_v57, %v3346_v57 }
 0x275   :  { %v735_v2 = vmul.f32 0.5, %v734_v26  ;;  %v1483_v26 = vmul.f32 %v3330_v53, %v3330_v53 }
 0x276   :  { %4031 = vst [vmem:[#allocation14_spill] sm:$0xff] %v3365_v18 }
 0x277   :  { %v736_v3 = vsub.f32 1.5, %v735_v2  ;;  %v1535_v2 = vadd.f32 %v1534_v44, %v1533_v25  ;;  %v3385_v44 = vsub.f32 %v3005_v59, %v3112_v42  ;;  %v3401_v59 = vld [vmem:[%s3941_s4 + $0x2] ss:$0 sm:$0xff] }
 0x279   :  { %v737_v24 = vmul.f32 %v2038_v54, %v736_v3  ;;  %v4029_v3 = vld [vmem:[#allocation16_spill] sm:$0xff] }
 0x27b   :  { %v3335_v12 = vsel %vm740_vm7, %v2038_v54, %v737_v24  ;;  %v3355_v54 = vld [vmem:[%s3941_s4 + $0x1] ss:$0 sm:$0xff]  ;;  %v3371_v24 = vsub.f32 %v2952_v14, %v3112_v42  ;;  %v1536_v14 = vsel %vm526_vm4, %v1483_v26, 0.0 }
 0x27c   :  { %v742_v10 = vmul.f32 %v3335_v12, %v4027_v36  ;;  %v743_v5 = vmul.f32 %v3335_v12, %v4028_v55  ;;  %v744_v6 = vmul.f32 %v3335_v12, %v4029_v3  ;;  %v745_v50 = vmul.f32 %v3335_v12, %v4032_v63  ;;  %v4034_v55 = vld [vmem:[#allocation19_spill] sm:$0xff] }
 0x27d   :  { %4033 = vst [vmem:[#allocation15_spill] sm:$0xff] %v3371_v24  ;;  %v746_v25 = vmul.f32 %v3335_v12, %v2944_v39  ;;  %v1484_v36 = vmul.f32 %v3339_v15, %v3339_v15  ;;  %v747_v34 = vmul.f32 %v3335_v12, %v4034_v55  ;;  %v3394_v3 = vsub.f32 %v3008_v40, %v3112_v42 }
 0x27e   :  { %v1537_v39 = vadd.f32 %v1536_v14, %v1535_v2  ;;  %v748_v37 = vmul.f32 %v3335_v12, %v2969_v61  ;;  %v777_v26 = vmul.f32 %v3355_v54, %v742_v10  ;;  %v778_v63 = vmul.f32 %v3355_v54, %v743_v5 }
 0x27f   :  { %v779_v55 = vmul.f32 %v3355_v54, %v744_v6  ;;  %v749_v40 = vmul.f32 %v3335_v12, %v2981_v49  ;;  %v780_v42 = vmul.f32 %v3355_v54, %v745_v50  ;;  %v1486_v2 = vmul.f32 %v3350_v41, %v3350_v41 }
 0x280   :  { %v1487_v14 = vmul.f32 %v3365_v18, %v3365_v18  ;;  %v750_v61 = vmul.f32 %v3335_v12, %v2990_v1  ;;  %v781_v10 = vmul.f32 %v3355_v54, %v746_v25  ;;  %v3420_v5 = vmul.f32 %v3371_v24, %v3371_v24 }
 0x281   :  { %v1538_v6 = vsel %vm526_vm4, %v1484_v36, 0.0  ;;  %v751_v49 = vmul.f32 %v3335_v12, %v2999_v9  ;;  %v752_v50 = vmul.f32 %v3335_v12, %v3012_v33  ;;  %v782_v41 = vmul.f32 %v3355_v54, %v747_v34 }
 0x282   :  { %v1539_v18 = vadd.f32 %v1538_v6, %v1537_v39  ;;  %v783_v57 = vmul.f32 %v3355_v54, %v748_v37  ;;  %v812_v1 = vadd.f32 %v3401_v59, %v777_v26  ;;  %v813_v25 = vadd.f32 %v3401_v59, %v778_v63 }
 0x283   :  { %v814_v24 = vadd.f32 %v3401_v59, %v779_v55  ;;  %v753_v36 = vmul.f32 %v3335_v12, %v3023_v21  ;;  %v784_v15 = vmul.f32 %v3355_v54, %v749_v40  ;;  %v815_v9 = vadd.f32 %v3401_v59, %v780_v42 }
 0x284   :  { %v1489_v33 = vmul.f32 %v3375_v13, %v3375_v13  ;;  %v754_v34 = vmul.f32 %v3335_v12, %v3030_v38  ;;  %v785_v39 = vmul.f32 %v3355_v54, %v750_v61  ;;  %v816_v37 = vadd.f32 %v3401_v59, %v781_v10  ;;  %844 = vst.msk [vmem:[%s3942_s5] sm:$0xff] %vm526_vm4, %v812_v1 }
 0x285   :  { %v3448_v21 = vmul.f32 %v3379_v7, %v3379_v7  ;;  %v755_v26 = vmul.f32 %v3335_v12, %v3037_v0  ;;  %v786_v63 = vmul.f32 %v3355_v54, %v751_v49  ;;  %v817_v38 = vadd.f32 %v3401_v59, %v782_v41  ;;  %845 = vst.msk [vmem:[%s3942_s5 + $0x8] sm:$0xff] %vm526_vm4, %v813_v25 }
 0x286   :  { %v1540_v55 = vsel %vm526_vm4, %v1485_v52, 0.0  ;;  %v756_v40 = vmul.f32 %v3335_v12, %v3044_v8  ;;  %v787_v42 = vmul.f32 %v3355_v54, %v752_v50  ;;  %v818_v61 = vadd.f32 %v3401_v59, %v783_v57  ;;  %846 = vst.msk [vmem:[%s3942_s5 + $0x10] sm:$0xff] %vm526_vm4, %v814_v24  ;;  %v4035_v50 = vld [vmem:[#allocation2_spill] sm:$0xff] }
 0x287   :  { %v1541_v0 = vadd.f32 %v1540_v55, %v1539_v18  ;;  %v757_v41 = vmul.f32 %v3335_v12, %v3051_v16  ;;  %v788_v10 = vmul.f32 %v3355_v54, %v753_v36  ;;  %v819_v52 = vadd.f32 %v3401_v59, %v784_v15  ;;  %847 = vst.msk [vmem:[%s3942_s5 + $0x18] sm:$0xff] %vm526_vm4, %v815_v9  ;;  %v4036_v9 = vld [vmem:[#allocation3_spill] sm:$0xff] }
 0x288   :  { %v1491_v8 = vmul.f32 %v3385_v44, %v3385_v44  ;;  %v758_v57 = vmul.f32 %v3335_v12, %v3058_v48  ;;  %v789_v18 = vmul.f32 %v3355_v54, %v754_v34  ;;  %v820_v24 = vadd.f32 %v3401_v59, %v785_v39  ;;  %848 = vst.msk [vmem:[%s3942_s5 + $0x20] sm:$0xff] %vm526_vm4, %v816_v37 }
 0x289   :  { %v3487_v16 = vmul.f32 %v3394_v3, %v3394_v3  ;;  %v759_v15 = vmul.f32 %v3335_v12, %v3065_v35  ;;  %v790_v6 = vmul.f32 %v3355_v54, %v755_v26  ;;  %v821_v48 = vadd.f32 %v3401_v59, %v786_v63  ;;  %849 = vst.msk [vmem:[%s3942_s5 + $0x28] sm:$0xff] %vm526_vm4, %v817_v38 }
 0x28a   :  { %v1542_v49 = vsel %vm526_vm4, %v1486_v2, 0.0  ;;  %v760_v1 = vmul.f32 %v3335_v12, %v4035_v50  ;;  %v791_v25 = vmul.f32 %v3355_v54, %v756_v40  ;;  %v822_v36 = vadd.f32 %v3401_v59, %v787_v42  ;;  %850 = vst.msk [vmem:[%s3942_s5 + $0x30] sm:$0xff] %vm526_vm4, %v818_v61  ;;  %v4037_v61 = vld [vmem:[#allocation4_spill] sm:$0xff] }
 0x28b   :  { %v1543_v35 = vadd.f32 %v1542_v49, %v1541_v0  ;;  %v761_v34 = vmul.f32 %v3335_v12, %v4036_v9  ;;  %v792_v39 = vmul.f32 %v3355_v54, %v757_v41  ;;  %v823_v2 = vadd.f32 %v3401_v59, %v788_v10  ;;  %851 = vst.msk [vmem:[%s3942_s5 + $0x38] sm:$0xff] %vm526_vm4, %v819_v52  ;;  %v4038_v52 = vld [vmem:[#allocation5_spill] sm:$0xff] }
 0x28c   :  { %v1544_v37 = vsel %vm526_vm4, %v1487_v14, 0.0  ;;  %v762_v26 = vmul.f32 %v3335_v12, %v3086_v29  ;;  %v793_v63 = vmul.f32 %v3355_v54, %v758_v57  ;;  %v824_v38 = vadd.f32 %v3401_v59, %v789_v18  ;;  %852 = vst.msk [vmem:[%s3942_s5 + $0x40] sm:$0xff] %vm526_vm4, %v820_v24 }
 0x28d   :  { %v1545_v55 = vadd.f32 %v1544_v37, %v1543_v35  ;;  %v763_v40 = vmul.f32 %v3335_v12, %v3093_v30  ;;  %v794_v42 = vmul.f32 %v3355_v54, %v759_v15  ;;  %v825_v14 = vadd.f32 %v3401_v59, %v790_v6  ;;  %853 = vst.msk [vmem:[%s3942_s5 + $0x48] sm:$0xff] %vm526_vm4, %v821_v48  ;;  %v4039_v15 = vld [vmem:[#allocation7_spill] sm:$0xff]  ;;  %v4040_v35 = vld [vmem:[#allocation20_spill] sm:$0xff] }
 0x28e   :  { %v1546_v29 = vsel %vm526_vm4, %v3420_v5, 0.0  ;;  %v764_v0 = vmul.f32 %v3335_v12, %v4037_v61  ;;  %v795_v41 = vmul.f32 %v3355_v54, %v760_v1  ;;  %v826_v10 = vadd.f32 %v3401_v59, %v791_v25  ;;  %854 = vst.msk [vmem:[%s3942_s5 + $0x50] sm:$0xff] %vm526_vm4, %v822_v36 }
 0x28f   :  { %v1547_v30 = vadd.f32 %v1546_v29, %v1545_v55  ;;  %v765_v57 = vmul.f32 %v3335_v12, %v4038_v52  ;;  %v796_v18 = vmul.f32 %v3355_v54, %v761_v34  ;;  %v827_v5 = vadd.f32 %v3401_v59, %v792_v39  ;;  %855 = vst.msk [vmem:[%s3942_s5 + $0x58] sm:$0xff] %vm526_vm4, %v823_v2  ;;  %v4041_v2 = vld [vmem:[#allocation21_spill] sm:$0xff] }
 0x290   :  { %v1548_v24 = vsel %vm526_vm4, %v1489_v33, 0.0  ;;  %v766_v6 = vmul.f32 %v3335_v12, %v4039_v15  ;;  %v797_v48 = vmul.f32 %v3355_v54, %v762_v26  ;;  %v828_v49 = vadd.f32 %v3401_v59, %v793_v63  ;;  %856 = vst.msk [vmem:[%s3942_s5 + $0x60] sm:$0xff] %vm526_vm4, %v824_v38 }
 0x291   :  { %v1549_v50 = vadd.f32 %v1548_v24, %v1547_v30  ;;  %v767_v1 = vmul.f32 %v3335_v12, %v3123_v51  ;;  %v798_v25 = vmul.f32 %v3355_v54, %v763_v40  ;;  %v829_v33 = vadd.f32 %v3401_v59, %v794_v42  ;;  %857 = vst.msk [vmem:[%s3942_s5 + $0x68] sm:$0xff] %vm526_vm4, %v825_v14  ;;  %v4042_v14 = vld [vmem:[#allocation23_spill] sm:$0xff] }
 0x292   :  { %v1550_v36 = vsel %vm526_vm4, %v3448_v21, 0.0  ;;  %v768_v9 = vmul.f32 %v3335_v12, %v4040_v35  ;;  %v799_v34 = vmul.f32 %v3355_v54, %v764_v0  ;;  %v830_v39 = vadd.f32 %v3401_v59, %v795_v41  ;;  %858 = vst.msk [vmem:[%s3942_s5 + $0x70] sm:$0xff] %vm526_vm4, %v826_v10 }
 0x293   :  { %v1551_v51 = vadd.f32 %v1550_v36, %v1549_v50  ;;  %v769_v37 = vmul.f32 %v3335_v12, %v4041_v2  ;;  %v800_v26 = vmul.f32 %v3355_v54, %v765_v57  ;;  %v831_v21 = vadd.f32 %v3401_v59, %v796_v18  ;;  %859 = vst.msk [vmem:[%s3942_s5 + $0x78] sm:$0xff] %vm526_vm4, %v827_v5 }
 0x294   :  { %v1552_v63 = vsel %vm526_vm4, %v1491_v8, 0.0  ;;  %v770_v38 = vmul.f32 %v3335_v12, %v3164_v60  ;;  %v801_v55 = vmul.f32 %v3355_v54, %v766_v6  ;;  %v832_v40 = vadd.f32 %v3401_v59, %v797_v48  ;;  %860 = vst.msk [vmem:[%s3942_s5 + $0x80] sm:$0xff] %vm526_vm4, %v828_v49 }
 0x295   :  { %v1553_v42 = vadd.f32 %v1552_v63, %v1551_v51  ;;  %v771_v29 = vmul.f32 %v3335_v12, %v4042_v14  ;;  %v802_v61 = vmul.f32 %v3355_v54, %v767_v1  ;;  %v833_v8 = vadd.f32 %v3401_v59, %v798_v25  ;;  %861 = vst.msk [vmem:[%s3942_s5 + $0x88] sm:$0xff] %vm526_vm4, %v829_v33  ;;  %v4044_v14 = vld [vmem:[#allocation6_spill] sm:$0xff] }
 0x296   :  { %v1554_v60 = vsel %vm526_vm4, %v3487_v16, 0.0  ;;  %v772_v0 = vmul.f32 %v3335_v12, %v3192_v4  ;;  %v803_v41 = vmul.f32 %v3355_v54, %v768_v9  ;;  %v834_v10 = vadd.f32 %v3401_v59, %v799_v34  ;;  %862 = vst.msk [vmem:[%s3942_s5 + $0x90] sm:$0xff] %vm526_vm4, %v830_v39 }
 0x297   :  { %v1555_v30 = vadd.f32 %v1554_v60, %v1553_v42  ;;  %v773_v52 = vmul.f32 %v3335_v12, %v3206_v17  ;;  %v804_v57 = vmul.f32 %v3355_v54, %v769_v37  ;;  %v835_v16 = vadd.f32 %v3401_v59, %v800_v26  ;;  %863 = vst.msk [vmem:[%s3942_s5 + $0x98] sm:$0xff] %vm526_vm4, %v831_v21  ;;  %v4046_v60 = vld [vmem:[#allocation10_spill] sm:$0xff] }
 0x298   :  { %v805_v4 = vmul.f32 %v3355_v54, %v770_v38  ;;  %v836_v18 = vadd.f32 %v3401_v59, %v801_v55  ;;  %864 = vst.msk [vmem:[%s3942_s5 + $0xa0] sm:$0xff] %vm526_vm4, %v832_v40  ;;  %v806_v17 = vmul.f32 %v3355_v54, %v771_v29  ;;  %v837_v12 = vadd.f32 %v3401_v59, %v802_v61  ;;  %v4043_v40 = vld [vmem:[#allocation8_spill] sm:$0xff]  ;;  %v4045_v61 = vld [vmem:[#allocation9_spill] sm:$0xff] }
 0x299   :  { %v1556_v5 = vrot.slane %v1555_v30, 4  ;;  %865 = vst.msk [vmem:[%s3942_s5 + $0xa8] sm:$0xff] %vm526_vm4, %v833_v8  ;;  %v807_v24 = vmul.f32 %v3355_v54, %v772_v0  ;;  %v838_v15 = vadd.f32 %v3401_v59, %v803_v41  ;;  %v808_v48 = vmul.f32 %v3355_v54, %v773_v52  ;;  %v4047_v41 = vld [vmem:[#allocation22_spill] sm:$0xff]  ;;  %v4048_v52 = vld [vmem:[#allocation11_spill] sm:$0xff] }
 0x29a   :  { %866 = vst.msk [vmem:[%s3942_s5 + $0xb0] sm:$0xff] %vm526_vm4, %v834_v10  ;;  %v839_v49 = vadd.f32 %v3401_v59, %v804_v57  ;;  %v840_v50 = vadd.f32 %v3401_v59, %v805_v4  ;;  %v841_v25 = vadd.f32 %v3401_v59, %v806_v17 }
 0x29b   :  { %v1557_v6 = vadd.f32 %v1556_v5, %v1555_v30  ;;  %867 = vst.msk [vmem:[%s3942_s5 + $0xb8] sm:$0xff] %vm526_vm4, %v835_v16  ;;  %v842_v33 = vadd.f32 %v3401_v59, %v807_v24  ;;  %v843_v35 = vadd.f32 %v3401_v59, %v808_v48 }
 0x29c   :  { %868 = vst.msk [vmem:[%s3942_s5 + $0xc0] sm:$0xff] %vm526_vm4, %v836_v18 }
 0x29d   :  { %v1558_v1 = vrot.slane %v1557_v6, 2  ;;  %869 = vst.msk [vmem:[%s3942_s5 + $0xc8] sm:$0xff] %vm526_vm4, %v837_v12 }
 0x29e   :  { %870 = vst.msk [vmem:[%s3942_s5 + $0xd0] sm:$0xff] %vm526_vm4, %v838_v15 }
 0x29f   :  { %v1559_v36 = vadd.f32 %v1558_v1, %v1557_v6  ;;  %871 = vst.msk [vmem:[%s3942_s5 + $0xd8] sm:$0xff] %vm526_vm4, %v839_v49 }
 0x2a0   :  { %872 = vst.msk [vmem:[%s3942_s5 + $0xe0] sm:$0xff] %vm526_vm4, %v840_v50 }
 0x2a1   :  { %v1560_v9 = vrot.slane %v1559_v36, 1  ;;  %873 = vst.msk [vmem:[%s3942_s5 + $0xe8] sm:$0xff] %vm526_vm4, %v841_v25 }
 0x2a2   :  { %874 = vst.msk [vmem:[%s3942_s5 + $0xf0] sm:$0xff] %vm526_vm4, %v842_v33 }
 0x2a3   :  { %v1561_v34 = vadd.f32 %v1560_v9, %v1559_v36  ;;  %875 = vst.msk [vmem:[%s3942_s5 + $0xf8] sm:$0xff] %vm526_vm4, %v843_v35 }
 0x2a5   :  { %v1562_v39 = vmul.f32 0.00390625, %v1561_v34 }
 0x2a7   :  { %v1563_v51 = vadd.f32 1e-05, %v1562_v39 }
 0x2a9   :  { %2039 = vrsqrt.f32 %v1563_v51  ;;  %vm1570_vm9 = vweird.f32 %v1563_v51 }
 0x2af   :  { %v2040_v2 = vpop.eup %2039 }
 0x2b0   :  { %v1565_v37 = vmul.f32 %v2040_v2, %v1563_v51  ;;  %vm1571_vm8 = vweird.f32 %v2040_v2 }
 0x2b1   :  { %vm1572_vm10 = vmor %vm1570_vm9, %vm1571_vm8 }
 0x2b2   :  { %v1566_v26 = vmul.f32 %v2040_v2, %v1565_v37 }
 0x2b4   :  { %v1567_v21 = vmul.f32 0.5, %v1566_v26 }
 0x2b6   :  { %v1568_v63 = vsub.f32 1.5, %v1567_v21 }
 0x2b8   :  { %v1569_v38 = vmul.f32 %v2040_v2, %v1568_v63 }
 0x2ba   :  { %v3679_v55 = vsel %vm1572_vm10, %v2040_v2, %v1569_v38 }
 0x2bb   :  { %v1574_v42 = vmul.f32 %v3679_v55, %v4043_v40  ;;  %v1575_v29 = vmul.f32 %v3679_v55, %v4044_v14  ;;  %v1576_v8 = vmul.f32 %v3679_v55, %v4045_v61  ;;  %v1577_v0 = vmul.f32 %v3679_v55, %v4046_v60 }
 0x2bc   :  { %v1578_v10 = vmul.f32 %v3679_v55, %v4047_v41  ;;  %v1579_v30 = vmul.f32 %v3679_v55, %v3184_v19  ;;  %v1580_v57 = vmul.f32 %v3679_v55, %v4048_v52  ;;  %v1581_v5 = vmul.f32 %v3679_v55, %v3213_v47 }
 0x2bd   :  { %v1606_v16 = vmul.f32 %v3355_v54, %v1574_v42  ;;  %v1607_v4 = vmul.f32 %v3355_v54, %v1575_v29  ;;  %v1608_v18 = vmul.f32 %v3355_v54, %v1576_v8  ;;  %v1609_v17 = vmul.f32 %v3355_v54, %v1577_v0 }
 0x2be   :  { %v1582_v12 = vmul.f32 %v3679_v55, %v3223_v23  ;;  %v1610_v24 = vmul.f32 %v3355_v54, %v1578_v10  ;;  %v1583_v19 = vmul.f32 %v3679_v55, %v3233_v31  ;;  %v1584_v15 = vmul.f32 %v3679_v55, %v3241_v58 }
 0x2bf   :  { %v1611_v6 = vmul.f32 %v3355_v54, %v1579_v30  ;;  %v1612_v48 = vmul.f32 %v3355_v54, %v1580_v57  ;;  %v1638_v49 = vadd.f32 %v3401_v59, %v1606_v16  ;;  %v1639_v47 = vadd.f32 %v3401_v59, %v1607_v4  ;;  %v4051_v4 = vld [vmem:[#allocation24_spill] sm:$0xff] }
 0x2c0   :  { %v1640_v50 = vadd.f32 %v3401_v59, %v1608_v18  ;;  %v1585_v23 = vmul.f32 %v3679_v55, %v3249_v11  ;;  %v1613_v1 = vmul.f32 %v3355_v54, %v1581_v5  ;;  %v1641_v31 = vadd.f32 %v3401_v59, %v1609_v17 }
 0x2c1   :  { %v1586_v58 = vmul.f32 %v3679_v55, %v3256_v27  ;;  %v1614_v25 = vmul.f32 %v3355_v54, %v1582_v12  ;;  %v1642_v33 = vadd.f32 %v3401_v59, %v1610_v24  ;;  %1873 = vst.msk [vmem:[%s3942_s5 + $0x100] sm:$0xff] %vm526_vm4, %v1638_v49  ;;  %v1587_v36 = vmul.f32 %v3679_v55, %v3263_v62  ;;  %v4052_v12 = vld [vmem:[#allocation14_spill] sm:$0xff] }
 0x2c2   :  { %v1615_v11 = vmul.f32 %v3355_v54, %v1583_v19  ;;  %v1643_v35 = vadd.f32 %v3401_v59, %v1611_v6  ;;  %1874 = vst.msk [vmem:[%s3942_s5 + $0x108] sm:$0xff] %vm526_vm4, %v1639_v47  ;;  %v1588_v27 = vmul.f32 %v3679_v55, %v3273_v22  ;;  %v1616_v9 = vmul.f32 %v3355_v54, %v1584_v15  ;;  %v4053_v6 = vld [vmem:[#allocation15_spill] sm:$0xff] }
 0x2c3   :  { %v1644_v34 = vadd.f32 %v3401_v59, %v1612_v48  ;;  %1875 = vst.msk [vmem:[%s3942_s5 + $0x110] sm:$0xff] %vm526_vm4, %v1640_v50  ;;  %v1589_v62 = vmul.f32 %v3679_v55, %v3281_v32  ;;  %v1617_v39 = vmul.f32 %v3355_v54, %v1585_v23  ;;  %v1645_v51 = vadd.f32 %v3401_v59, %v1613_v1 }
 0x2c4   :  { %1876 = vst.msk [vmem:[%s3942_s5 + $0x118] sm:$0xff] %vm526_vm4, %v1641_v31  ;;  %v1590_v22 = vmul.f32 %v3679_v55, %v3288_v43  ;;  %v1618_v2 = vmul.f32 %v3355_v54, %v1586_v58  ;;  %v1646_v37 = vadd.f32 %v3401_v59, %v1614_v25  ;;  %v1591_v32 = vmul.f32 %v3679_v55, %v3295_v20 }
 0x2c5   :  { %1877 = vst.msk [vmem:[%s3942_s5 + $0x120] sm:$0xff] %vm526_vm4, %v1642_v33  ;;  %v1619_v26 = vmul.f32 %v3355_v54, %v1587_v36  ;;  %v1647_v21 = vadd.f32 %v3401_v59, %v1615_v11  ;;  %v1592_v43 = vmul.f32 %v3679_v55, %v3302_v46  ;;  %v1620_v63 = vmul.f32 %v3355_v54, %v1588_v27 }
 0x2c6   :  { %1878 = vst.msk [vmem:[%s3942_s5 + $0x128] sm:$0xff] %vm526_vm4, %v1643_v35  ;;  %v1648_v38 = vadd.f32 %v3401_v59, %v1616_v9  ;;  %v1593_v20 = vmul.f32 %v3679_v55, %v3309_v28  ;;  %v1621_v40 = vmul.f32 %v3355_v54, %v1589_v62  ;;  %v1649_v42 = vadd.f32 %v3401_v59, %v1617_v39 }
 0x2c7   :  { %1879 = vst.msk [vmem:[%s3942_s5 + $0x130] sm:$0xff] %vm526_vm4, %v1644_v34  ;;  %v1594_v46 = vmul.f32 %v3679_v55, %v3316_v45  ;;  %v1622_v14 = vmul.f32 %v3355_v54, %v1590_v22  ;;  %v1650_v29 = vadd.f32 %v3401_v59, %v1618_v2  ;;  %v1595_v28 = vmul.f32 %v3679_v55, %v3323_v56  ;;  %v4049_v56 = vld [vmem:[#allocation12_spill] sm:$0xff] }
 0x2c8   :  { %1880 = vst.msk [vmem:[%s3942_s5 + $0x138] sm:$0xff] %vm526_vm4, %v1645_v51  ;;  %v1623_v61 = vmul.f32 %v3355_v54, %v1591_v32  ;;  %v1651_v8 = vadd.f32 %v3401_v59, %v1619_v26  ;;  %v1596_v45 = vmul.f32 %v3679_v55, %v3330_v53  ;;  %v1624_v60 = vmul.f32 %v3355_v54, %v1592_v43  ;;  %v4050_v53 = vld [vmem:[#allocation13_spill] sm:$0xff] }
 0x2c9   :  { %1881 = vst.msk [vmem:[%s3942_s5 + $0x140] sm:$0xff] %vm526_vm4, %v1646_v37  ;;  %v1652_v0 = vadd.f32 %v3401_v59, %v1620_v63  ;;  %v1597_v41 = vmul.f32 %v3679_v55, %v4049_v56  ;;  %v1625_v10 = vmul.f32 %v3355_v54, %v1593_v20  ;;  %v1653_v30 = vadd.f32 %v3401_v59, %v1621_v40 }
 0x2ca   :  { %1882 = vst.msk [vmem:[%s3942_s5 + $0x148] sm:$0xff] %vm526_vm4, %v1647_v21  ;;  %v1598_v52 = vmul.f32 %v3679_v55, %v4050_v53  ;;  %v1626_v57 = vmul.f32 %v3355_v54, %v1594_v46  ;;  %v1654_v16 = vadd.f32 %v3401_v59, %v1622_v14  ;;  %v1599_v18 = vmul.f32 %v3679_v55, %v4051_v4 }
 0x2cb   :  { %1883 = vst.msk [vmem:[%s3942_s5 + $0x150] sm:$0xff] %vm526_vm4, %v1648_v38  ;;  %v1627_v5 = vmul.f32 %v3355_v54, %v1595_v28  ;;  %v1655_v17 = vadd.f32 %v3401_v59, %v1623_v61  ;;  %v1600_v24 = vmul.f32 %v3679_v55, %v4052_v12  ;;  %v1628_v19 = vmul.f32 %v3355_v54, %v1596_v45 }
 0x2cc   :  { %1884 = vst.msk [vmem:[%s3942_s5 + $0x158] sm:$0xff] %vm526_vm4, %v1649_v42  ;;  %v1656_v15 = vadd.f32 %v3401_v59, %v1624_v60  ;;  %v1601_v48 = vmul.f32 %v3679_v55, %v4053_v6  ;;  %v1629_v49 = vmul.f32 %v3355_v54, %v1597_v41  ;;  %v1657_v47 = vadd.f32 %v3401_v59, %v1625_v10 }
 0x2cd   :  { %1885 = vst.msk [vmem:[%s3942_s5 + $0x160] sm:$0xff] %vm526_vm4, %v1650_v29  ;;  %v1602_v50 = vmul.f32 %v3679_v55, %v3375_v13  ;;  %v1630_v23 = vmul.f32 %v3355_v54, %v1598_v52  ;;  %v1658_v1 = vadd.f32 %v3401_v59, %v1626_v57  ;;  %v1603_v31 = vmul.f32 %v3679_v55, %v3379_v7 }
 0x2ce   :  { %1886 = vst.msk [vmem:[%s3942_s5 + $0x168] sm:$0xff] %vm526_vm4, %v1651_v8  ;;  %v1631_v58 = vmul.f32 %v3355_v54, %v1599_v18  ;;  %v1659_v25 = vadd.f32 %v3401_v59, %v1627_v5  ;;  %v1604_v13 = vmul.f32 %v3679_v55, %v3385_v44  ;;  %v1632_v33 = vmul.f32 %v3355_v54, %v1600_v24 }
 0x2cf   :  { %1887 = vst.msk [vmem:[%s3942_s5 + $0x170] sm:$0xff] %vm526_vm4, %v1652_v0  ;;  %v1660_v36 = vadd.f32 %v3401_v59, %v1628_v19  ;;  %v1605_v7 = vmul.f32 %v3679_v55, %v3394_v3  ;;  %v1633_v11 = vmul.f32 %v3355_v54, %v1601_v48  ;;  %v1661_v35 = vadd.f32 %v3401_v59, %v1629_v49 }
 0x2d0   :  { %1888 = vst.msk [vmem:[%s3942_s5 + $0x178] sm:$0xff] %vm526_vm4, %v1653_v30  ;;  %v1634_v44 = vmul.f32 %v3355_v54, %v1602_v50  ;;  %v1662_v27 = vadd.f32 %v3401_v59, %v1630_v23  ;;  %v1635_v3 = vmul.f32 %v3355_v54, %v1603_v31  ;;  %v1663_v55 = vadd.f32 %v3401_v59, %v1631_v58 }
 0x2d1   :  { %1889 = vst.msk [vmem:[%s3942_s5 + $0x180] sm:$0xff] %vm526_vm4, %v1654_v16  ;;  %v1636_v9 = vmul.f32 %v3355_v54, %v1604_v13  ;;  %v1664_v34 = vadd.f32 %v3401_v59, %v1632_v33  ;;  %v1637_v62 = vmul.f32 %v3355_v54, %v1605_v7  ;;  %v1665_v39 = vadd.f32 %v3401_v59, %v1633_v11 }
 0x2d2   :  { %1890 = vst.msk [vmem:[%s3942_s5 + $0x188] sm:$0xff] %vm526_vm4, %v1655_v17  ;;  %v1666_v51 = vadd.f32 %v3401_v59, %v1634_v44  ;;  %v1667_v22 = vadd.f32 %v3401_v59, %v1635_v3 }
 0x2d3   :  { %1891 = vst.msk [vmem:[%s3942_s5 + $0x190] sm:$0xff] %vm526_vm4, %v1656_v15  ;;  %v1668_v54 = vadd.f32 %v3401_v59, %v1636_v9  ;;  %v1669_v2 = vadd.f32 %v3401_v59, %v1637_v62 }
 0x2d4   :  { %1892 = vst.msk [vmem:[%s3942_s5 + $0x198] sm:$0xff] %vm526_vm4, %v1657_v47 }
 0x2d5   :  { %1893 = vst.msk [vmem:[%s3942_s5 + $0x1a0] sm:$0xff] %vm526_vm4, %v1658_v1 }
 0x2d6   :  { %1894 = vst.msk [vmem:[%s3942_s5 + $0x1a8] sm:$0xff] %vm526_vm4, %v1659_v25 }
 0x2d7   :  { %1895 = vst.msk [vmem:[%s3942_s5 + $0x1b0] sm:$0xff] %vm526_vm4, %v1660_v36 }
 0x2d8   :  { %1896 = vst.msk [vmem:[%s3942_s5 + $0x1b8] sm:$0xff] %vm526_vm4, %v1661_v35 }
 0x2d9   :  { %1897 = vst.msk [vmem:[%s3942_s5 + $0x1c0] sm:$0xff] %vm526_vm4, %v1662_v27 }
 0x2da   :  { %1898 = vst.msk [vmem:[%s3942_s5 + $0x1c8] sm:$0xff] %vm526_vm4, %v1663_v55 }
 0x2db   :  { %1899 = vst.msk [vmem:[%s3942_s5 + $0x1d0] sm:$0xff] %vm526_vm4, %v1664_v34 }
 0x2dc   :  { %1900 = vst.msk [vmem:[%s3942_s5 + $0x1d8] sm:$0xff] %vm526_vm4, %v1665_v39 }
 0x2dd   :  { %1901 = vst.msk [vmem:[%s3942_s5 + $0x1e0] sm:$0xff] %vm526_vm4, %v1666_v51 }
 0x2de   :  { %1902 = vst.msk [vmem:[%s3942_s5 + $0x1e8] sm:$0xff] %vm526_vm4, %v1667_v22 }
 0x2df   :  { %1903 = vst.msk [vmem:[%s3942_s5 + $0x1f0] sm:$0xff] %vm526_vm4, %v1668_v54 }
 0x2e0   :  { %1904 = vst.msk [vmem:[%s3942_s5 + $0x1f8] sm:$0xff] %vm526_vm4, %v1669_v2 }

</bundles_post_ra>
